<compile_context>
chip_gen: v7x
topology: tpu7x:2x2x1
jax: 0.10.0
libtpu: 0.0.40
codegen_flags: <defaults>
</compile_context>

<pallas_src>
import jax
import jax.numpy as jnp
from jax.experimental import pallas as pl
from jax.experimental.pallas import tpu as pltpu

_CONV_CHANNELS = ((1, 4), (4, 8), (8, 16), (16, 32))
_HIDDEN = 500          # torch hidden size
_HIDDEN_PAD = 512      # padded to a multiple of 128 for clean lane tiling


def _round_up(x, m):
    return ((x + m - 1) // m) * m


def _choose_btile(batch):
    """Batch tile: multiple of 8 (sublane tiling), big enough to fill MXU rows
    (layer-1 conv M = btile*16), and (when batch allows) >= 2 grid steps so
    v7x's second TensorCore gets work."""
    if batch >= 256:
        return 64
    if batch >= 64:
        return 32
    if batch >= 16:
        return 8
    return batch                      # tiny batch: single step, block == full dims


# ---------------------------------------------------------------------------
# Fused Pallas kernel: whole forward pass, `btile` images per grid step.
# Activation layout: (btile*H, W*C) -- batch and image rows stacked on
# sublanes, pixel columns x channels fused into lanes.
# ---------------------------------------------------------------------------
def _conv_relu_pool_block(act, bw_ref, bias_ref, qe_ref, qo_ref,
                          mt_ref, mb_ref, y_scr):
    """One `Conv2d(3x3, pad=1) + ReLU + MaxPool2d(2,2)` block on a stacked tile.

    act      : (n, wc) = (btile*H, W*Cin) f32 activation.
    bw_ref   : (3*wc, W*Cout) bf16 banded conv weights (one row block per
               vertical tap; horizontal taps + horizontal padding folded in).
    bias_ref : (1, W*Cout) f32 bias tiled across pixel columns.
    qe/qo    : (W*Cout, (W/2)*Cout) bf16 even/odd pixel-column pool selectors.
    mt/mb    : (n, 1) f32 masks zeroing per-image top / bottom boundary rows
               (restore "SAME" vertical zero padding in the stacked layout).
    y_scr    : (n, W*Cout) f32 VMEM scratch used for the row pooling.
    """
    f32, bf16 = jnp.float32, jnp.bfloat16
    n, wc = act.shape

    # +-1-row shifted tap operands (value-level shift + per-image boundary mask).
    zero_row = jnp.zeros((1, wc), f32)
    up = jnp.concatenate([zero_row, act[:n - 1, :]], axis=0) * mt_ref[...]  # act[r-1]
    dn = jnp.concatenate([act[1:, :], zero_row], axis=0) * mb_ref[...]      # act[r+1]

    # conv3x3 "SAME" as three banded matmuls (bf16 operands, f32 accumulate).
    y = bias_ref[...]
    y = y + jnp.dot(up.astype(bf16), bw_ref[0:wc, :],
                    preferred_element_type=f32)
    y = y + jnp.dot(act.astype(bf16), bw_ref[wc:2 * wc, :],
                    preferred_element_type=f32)
    y = y + jnp.dot(dn.astype(bf16), bw_ref[2 * wc:3 * wc, :],
                    preferred_element_type=f32)
    y = jnp.maximum(y, 0.0)                                   # ReLU, (n, W*Cout)

    # MaxPool2d(2,2), row half: one store + two sublane-strided loads (stride 2)
    # -> batch-tile-independent cost (no O(btile^2) selector matmuls).
    y_scr[...] = y
    half = n // 2
    z = jnp.maximum(y_scr[pl.ds(0, half, 2), :],
                    y_scr[pl.ds(1, half, 2), :])              # (n/2, W*Cout)

    # MaxPool2d(2,2), pixel-column half: tiny even/odd selector matmuls.
    zb = z.astype(bf16)
    return jnp.maximum(
        jnp.dot(zb, qe_ref[...], preferred_element_type=f32),
        jnp.dot(zb, qo_ref[...], preferred_element_type=f32))  # (n/2, (W/2)*Cout)


def network_kernel(*refs):
    # refs = [x] + [bw, bias, qe, qo, mask_top, mask_bot] * n_conv
    #        + [fc1_w, fc1_b, fc2_w, fc2_b] + [out] + [y_scratch] * n_conv
    n_conv = len(_CONV_CHANNELS)
    x_ref = refs[0]
    conv_refs = refs[1:1 + 6 * n_conv]
    f1w_ref, f1b_ref, f2w_ref, f2b_ref = refs[1 + 6 * n_conv:5 + 6 * n_conv]
    o_ref = refs[5 + 6 * n_conv]
    scr_refs = refs[6 + 6 * n_conv:]

    f32, bf16 = jnp.float32, jnp.bfloat16
    act = x_ref[...]                            # (btile*16, 16), Cin = 1
    for i in range(n_conv):
        bw, bias, qe, qo, mt, mb = conv_refs[6 * i:6 * i + 6]
        act = _conv_relu_pool_block(act, bw, bias, qe, qo, mt, mb, scr_refs[i])

    # act: (btile, 32) -- final spatial is 1x1, so torch's NCHW flatten is pure
    # channel order.  Dropout(0.5) is identity at inference time.
    # TODO(synk): training-mode dropout (pltpu.prng_random_bits mask) not implemented.
    h = jnp.maximum(
        jnp.dot(act.astype(bf16), f1w_ref[...], preferred_element_type=f32)
        + f1b_ref[...], 0.0)                    # (btile, 512)
    y = jnp.maximum(
        jnp.dot(h.astype(bf16), f2w_ref[...], preferred_element_type=f32)
        + f2b_ref[...], 0.0)                    # (btile, 128) lane-dense store
    o_ref[...] = y


# ---------------------------------------------------------------------------
# Init-time preprocessing (pure layout work, zero runtime cost).
# ---------------------------------------------------------------------------
def _prepare_operands(params, img_h, img_w, btile, out_pad):
    f32, bf16 = jnp.float32, jnp.bfloat16
    ops = []
    H, W = img_h, img_w
    for i, (cin, cout) in enumerate(_CONV_CHANNELS):
        wc = params[f"cv{i + 1}_w"]                 # (3, 3, cin, cout) [kh,kw,ci,co]
        b = params[f"cv{i + 1}_b"]                  # (cout,)

        # Banded weight: bw[kh*W*cin + w_in*cin + ci, w*cout + co]
        #   = wc[kh, w_in - w + 1, ci, co]  if |w_in - w| <= 1 else 0
        kw_idx = jnp.arange(W)[:, None] - jnp.arange(W)[None, :] + 1   # (w_in, w)
        valid = (kw_idx >= 0) & (kw_idx <= 2)
        gath = jnp.take(wc, jnp.clip(kw_idx, 0, 2), axis=1)  # (3, W, W, cin, cout)
        gath = jnp.where(valid[None, :, :, None, None], gath, 0.0)
        bw = jnp.transpose(gath, (0, 1, 3, 2, 4)).reshape(3 * W * cin, W * cout)
        bias_row = jnp.tile(b, W).reshape(1, W * cout).astype(f32)

        # 2x2 max-pool pixel-column selectors (batch-independent, tiny).
        s = jnp.arange(W * cout)
        t = jnp.arange((W // 2) * cout)
        w_s, c_s = s // cout, s % cout
        w_t, c_t = t // cout, t % cout
        qe = ((c_s[:, None] == c_t[None, :]) &
              (w_s[:, None] == 2 * w_t[None, :])).astype(bf16)
        qo = ((c_s[:, None] == c_t[None, :]) &
              (w_s[:, None] == 2 * w_t[None, :] + 1)).astype(bf16)

        # Per-image vertical boundary masks for the batch-stacked layout.
        r = jnp.arange(btile * H)
        mask_top = ((r % H) != 0).astype(f32).reshape(btile * H, 1)
        mask_bot = ((r % H) != (H - 1)).astype(f32).reshape(btile * H, 1)

        ops += [bw.astype(bf16), bias_row, qe, qo, mask_top, mask_bot]
        H, W = H // 2, W // 2

    # Final conv output is 1x1 spatial here, so the kernel's flatten equals
    # torch's NCHW .view() flatten (pure channel order).
    # TODO(synk): configs with final spatial > 1x1 would need an fc1 row
    # permutation and an in-kernel flatten; not needed for this module config.
    assert H == 1 and W == 1, (H, W)

    out_dim = params["fc2_w"].shape[1]
    fc1_w = jnp.pad(params["fc1_w"],
                    ((0, 0), (0, _HIDDEN_PAD - _HIDDEN))).astype(bf16)
    fc1_b = jnp.pad(params["fc1_b"],
                    (0, _HIDDEN_PAD - _HIDDEN)).reshape(1, _HIDDEN_PAD).astype(f32)
    fc2_w = jnp.pad(params["fc2_w"],
                    ((0, _HIDDEN_PAD - _HIDDEN), (0, out_pad - out_dim))).astype(bf16)
    fc2_b = jnp.pad(params["fc2_b"],
                    (0, out_pad - out_dim)).reshape(1, out_pad).astype(f32)
    ops += [fc1_w, fc1_b, fc2_w, fc2_b]
    return ops


def build_forward(params, batch, patch_width, patch_height, num_oh, px, btile=None):
    img_h, img_w = patch_height * px, patch_width * px
    out_size = patch_width * patch_height * num_oh
    out_pad = _round_up(out_size, 128)

    if btile is None:
        btile = _choose_btile(batch)
    num_steps = pl.cdiv(batch, btile)
    padded_b = num_steps * btile

    operands = _prepare_operands(params, img_h, img_w, btile, out_pad)

    # Input images are pre-reshaped in the wrapper to (padded_b*img_h, img_w),
    # so each grid step gets a (btile*img_h, img_w) stacked slab directly.
    in_specs = [pl.BlockSpec((btile * img_h, img_w), lambda g: (g, 0))]
    in_specs += [pl.BlockSpec(op.shape, lambda g: (0, 0)) for op in operands]
    out_spec = pl.BlockSpec((btile, out_pad), lambda g: (g, 0))

    # One f32 scratch per conv layer for the row-pool store/strided-reload.
    scratch_shapes = []
    H, W = img_h, img_w
    for (_, cout) in _CONV_CHANNELS:
        scratch_shapes.append(pltpu.VMEM((btile * H, W * cout), jnp.float32))
        H, W = H // 2, W // 2

    fused_call = pl.pallas_call(
        network_kernel,
        out_shape=jax.ShapeDtypeStruct((padded_b, out_pad), jnp.float32),
        grid_spec=pltpu.PrefetchScalarGridSpec(
            num_scalar_prefetch=0,
            grid=(num_steps,),                   # btile images per step
            in_specs=in_specs,
            out_specs=out_spec,
            scratch_shapes=scratch_shapes,
        ),
        compiler_params=pltpu.CompilerParams(
            dimension_semantics=("parallel",)),  # megacore-shardable batch axis
    )

    @jax.jit
    def forward(x):
        x = x.astype(jnp.float32)
        if padded_b != batch:
            x = jnp.pad(x, ((0, padded_b - batch), (0, 0), (0, 0)))
        x2 = x.reshape(padded_b * img_h, img_w)          # stack images on rows
        out = fused_call(x2, *operands)
        out = out[:batch, :out_size]
        return out.reshape(batch, patch_height, patch_width, num_oh)

    return forward


# ---------------------------------------------------------------------------
# Deterministic synthetic parameters (conv weights in HWIO layout).
# ---------------------------------------------------------------------------
def init_params(key, patch_width, patch_height, num_oh, px):
    img_w, img_h = patch_width * px, patch_height * px
    inp = int(3 * img_w * img_h * 3 / (8 * 9))        # torch formula -> 32
    out_size = patch_width * patch_height * num_oh
    keys = jax.random.split(key, 2 * len(_CONV_CHANNELS) + 4)
    params = {}
    k = 0
    for i, (cin, cout) in enumerate(_CONV_CHANNELS):
        params[f"cv{i + 1}_w"] = (
            jax.random.normal(keys[k], (3, 3, cin, cout), jnp.float32)
            / jnp.sqrt(jnp.float32(9 * cin)))
        params[f"cv{i + 1}_b"] = 0.01 * jax.random.normal(keys[k + 1], (cout,), jnp.float32)
        k += 2
    params["fc1_w"] = (jax.random.normal(keys[k], (inp, _HIDDEN), jnp.float32)
                       / jnp.sqrt(jnp.float32(inp)))
    params["fc1_b"] = 0.01 * jax.random.normal(keys[k + 1], (_HIDDEN,), jnp.float32)
    params["fc2_w"] = (jax.random.normal(keys[k + 2], (_HIDDEN, out_size), jnp.float32)
                       / jnp.sqrt(jnp.float32(_HIDDEN)))
    params["fc2_b"] = 0.01 * jax.random.normal(keys[k + 3], (out_size,), jnp.float32)
    return params


# ---------------------------------------------------------------------------
# Plain-JAX reference mirroring Network.forward (eval mode), for validation.
# ---------------------------------------------------------------------------
def reference_forward(params, x, patch_width, patch_height, num_oh):
    B = x.shape[0]
    out = x[..., None].astype(jnp.float32)            # NHWC, Cin = 1
    for i in range(len(_CONV_CHANNELS)):
        out = jax.lax.conv_general_dilated(
            out, params[f"cv{i + 1}_w"], window_strides=(1, 1), padding="SAME",
            dimension_numbers=("NHWC", "HWIO", "NHWC"))
        out = jnp.maximum(out + params[f"cv{i + 1}_b"], 0.0)
        Bb, H, W, C = out.shape
        out = out.reshape(Bb, H // 2, 2, W // 2, 2, C).max(axis=(2, 4))
    out = jnp.transpose(out, (0, 3, 1, 2)).reshape(B, -1)   # torch NCHW .view()
    out = jnp.maximum(out @ params["fc1_w"] + params["fc1_b"], 0.0)
    out = jnp.maximum(out @ params["fc2_w"] + params["fc2_b"], 0.0)
    return out.reshape(B, patch_height, patch_width, num_oh)


# ---------------------------------------------------------------------------
if __name__ == "__main__":
    patch_width, patch_height, num_oh, px = 4, 4, 3, 4     # 16x16 single-channel input
    img_h, img_w = patch_height * px, patch_width * px

    key = jax.random.PRNGKey(0)
    k_params, k_x1, k_x2 = jax.random.split(key, 3)
    params = init_params(k_params, patch_width, patch_height, num_oh, px)

    # Small smoke test: B=2 (single grid step, btile=2).
    B1 = 2
    x1 = jax.random.normal(k_x1, (B1, img_h, img_w), jnp.float32)
    fwd1 = build_forward(params, B1, patch_width, patch_height, num_oh, px)
    out1 = jax.block_until_ready(fwd1(x1))
    assert out1.shape == (B1, patch_height, patch_width, num_oh), out1.shape
    assert bool(jnp.all(jnp.isfinite(out1)))
    ref1 = reference_forward(params, x1, patch_width, patch_height, num_oh)
    err1 = float(jnp.max(jnp.abs(out1 - ref1)))
    assert bool(jnp.allclose(out1, ref1, rtol=5e-2, atol=5e-2)), err1

    # Batch-tiled path: B=20 -> btile=8, 3 "parallel" grid steps, padded batch.
    B2 = 20
    x2 = jax.random.normal(k_x2, (B2, img_h, img_w), jnp.float32)
    fwd2 = build_forward(params, B2, patch_width, patch_height, num_oh, px)
    out2 = jax.block_until_ready(fwd2(x2))
    assert out2.shape == (B2, patch_height, patch_width, num_oh), out2.shape
    ref2 = reference_forward(params, x2, patch_width, patch_height, num_oh)
    err2 = float(jnp.max(jnp.abs(out2 - ref2)))
    assert bool(jnp.allclose(out2, ref2, rtol=5e-2, atol=5e-2)), err2

    print("KERNEL_OK")
</pallas_src>

<mosaic_0001>
module attributes {stable_mosaic.version = 11 : i64} {
  func.func @network_kernel(%arg0: i32, %arg1: memref<32x16xf32, #tpu.memory_space<vmem>>, %arg2: memref<48x64xbf16, #tpu.memory_space<vmem>>, %arg3: memref<1x64xf32, #tpu.memory_space<vmem>>, %arg4: memref<64x32xbf16, #tpu.memory_space<vmem>>, %arg5: memref<64x32xbf16, #tpu.memory_space<vmem>>, %arg6: memref<32x1xf32, #tpu.memory_space<vmem>>, %arg7: memref<32x1xf32, #tpu.memory_space<vmem>>, %arg8: memref<96x64xbf16, #tpu.memory_space<vmem>>, %arg9: memref<1x64xf32, #tpu.memory_space<vmem>>, %arg10: memref<64x32xbf16, #tpu.memory_space<vmem>>, %arg11: memref<64x32xbf16, #tpu.memory_space<vmem>>, %arg12: memref<16x1xf32, #tpu.memory_space<vmem>>, %arg13: memref<16x1xf32, #tpu.memory_space<vmem>>, %arg14: memref<96x64xbf16, #tpu.memory_space<vmem>>, %arg15: memref<1x64xf32, #tpu.memory_space<vmem>>, %arg16: memref<64x32xbf16, #tpu.memory_space<vmem>>, %arg17: memref<64x32xbf16, #tpu.memory_space<vmem>>, %arg18: memref<8x1xf32, #tpu.memory_space<vmem>>, %arg19: memref<8x1xf32, #tpu.memory_space<vmem>>, %arg20: memref<96x64xbf16, #tpu.memory_space<vmem>>, %arg21: memref<1x64xf32, #tpu.memory_space<vmem>>, %arg22: memref<64x32xbf16, #tpu.memory_space<vmem>>, %arg23: memref<64x32xbf16, #tpu.memory_space<vmem>>, %arg24: memref<4x1xf32, #tpu.memory_space<vmem>>, %arg25: memref<4x1xf32, #tpu.memory_space<vmem>>, %arg26: memref<32x512xbf16, #tpu.memory_space<vmem>>, %arg27: memref<1x512xf32, #tpu.memory_space<vmem>>, %arg28: memref<512x128xbf16, #tpu.memory_space<vmem>>, %arg29: memref<1x128xf32, #tpu.memory_space<vmem>>, %arg30: memref<2x128xf32, #tpu.memory_space<vmem>>, %arg31: memref<32x64xf32, #tpu.memory_space<vmem>>, %arg32: memref<16x64xf32, #tpu.memory_space<vmem>>, %arg33: memref<8x64xf32, #tpu.memory_space<vmem>>, %arg34: memref<4x64xf32, #tpu.memory_space<vmem>>) attributes {dimension_semantics = [#tpu.dimension_semantics<parallel>], iteration_bounds = array<i64: 1>, scalar_prefetch = 0 : i64, scratch_operands = 4 : i64, tpu.core_type = #tpu.core_type<tc>, window_params = [{transform_indices = @transform_0, window_bounds = array<i64: 32, 16>}, {pipeline_mode = #tpu.pipeline_mode<synchronous>, transform_indices = @transform_1, window_bounds = array<i64: 48, 64>}, {pipeline_mode = #tpu.pipeline_mode<synchronous>, transform_indices = @transform_2, window_bounds = array<i64: 1, 64>}, {pipeline_mode = #tpu.pipeline_mode<synchronous>, transform_indices = @transform_3, window_bounds = array<i64: 64, 32>}, {pipeline_mode = #tpu.pipeline_mode<synchronous>, transform_indices = @transform_4, window_bounds = array<i64: 64, 32>}, {pipeline_mode = #tpu.pipeline_mode<synchronous>, transform_indices = @transform_5, window_bounds = array<i64: 32, 1>}, {pipeline_mode = #tpu.pipeline_mode<synchronous>, transform_indices = @transform_6, window_bounds = array<i64: 32, 1>}, {pipeline_mode = #tpu.pipeline_mode<synchronous>, transform_indices = @transform_7, window_bounds = array<i64: 96, 64>}, {pipeline_mode = #tpu.pipeline_mode<synchronous>, transform_indices = @transform_8, window_bounds = array<i64: 1, 64>}, {pipeline_mode = #tpu.pipeline_mode<synchronous>, transform_indices = @transform_9, window_bounds = array<i64: 64, 32>}, {pipeline_mode = #tpu.pipeline_mode<synchronous>, transform_indices = @transform_10, window_bounds = array<i64: 64, 32>}, {pipeline_mode = #tpu.pipeline_mode<synchronous>, transform_indices = @transform_11, window_bounds = array<i64: 16, 1>}, {pipeline_mode = #tpu.pipeline_mode<synchronous>, transform_indices = @transform_12, window_bounds = array<i64: 16, 1>}, {pipeline_mode = #tpu.pipeline_mode<synchronous>, transform_indices = @transform_13, window_bounds = array<i64: 96, 64>}, {pipeline_mode = #tpu.pipeline_mode<synchronous>, transform_indices = @transform_14, window_bounds = array<i64: 1, 64>}, {pipeline_mode = #tpu.pipeline_mode<synchronous>, transform_indices = @transform_15, window_bounds = array<i64: 64, 32>}, {pipeline_mode = #tpu.pipeline_mode<synchronous>, transform_indices = @transform_16, window_bounds = array<i64: 64, 32>}, {pipeline_mode = #tpu.pipeline_mode<synchronous>, transform_indices = @transform_17, window_bounds = array<i64: 8, 1>}, {pipeline_mode = #tpu.pipeline_mode<synchronous>, transform_indices = @transform_18, window_bounds = array<i64: 8, 1>}, {pipeline_mode = #tpu.pipeline_mode<synchronous>, transform_indices = @transform_19, window_bounds = array<i64: 96, 64>}, {pipeline_mode = #tpu.pipeline_mode<synchronous>, transform_indices = @transform_20, window_bounds = array<i64: 1, 64>}, {pipeline_mode = #tpu.pipeline_mode<synchronous>, transform_indices = @transform_21, window_bounds = array<i64: 64, 32>}, {pipeline_mode = #tpu.pipeline_mode<synchronous>, transform_indices = @transform_22, window_bounds = array<i64: 64, 32>}, {pipeline_mode = #tpu.pipeline_mode<synchronous>, transform_indices = @transform_23, window_bounds = array<i64: 4, 1>}, {pipeline_mode = #tpu.pipeline_mode<synchronous>, transform_indices = @transform_24, window_bounds = array<i64: 4, 1>}, {pipeline_mode = #tpu.pipeline_mode<synchronous>, transform_indices = @transform_25, window_bounds = array<i64: 32, 512>}, {pipeline_mode = #tpu.pipeline_mode<synchronous>, transform_indices = @transform_26, window_bounds = array<i64: 1, 512>}, {pipeline_mode = #tpu.pipeline_mode<synchronous>, transform_indices = @transform_27, window_bounds = array<i64: 512, 128>}, {pipeline_mode = #tpu.pipeline_mode<synchronous>, transform_indices = @transform_28, window_bounds = array<i64: 1, 128>}, {transform_indices = @transform_29, window_bounds = array<i64: 2, 128>}]} {
    %c0 = arith.constant 0 : index
    %c0_0 = arith.constant 0 : index
    %0 = vector.load %arg1[%c0, %c0_0] : memref<32x16xf32, #tpu.memory_space<vmem>>, vector<32x16xf32>
    %cst = arith.constant 0.000000e+00 : f32
    %1 = vector.broadcast %cst : f32 to vector<1x16xf32>
    %2 = vector.extract_strided_slice %0 {offsets = [0, 0], sizes = [31, 16], strides = [1, 1]} : vector<32x16xf32> to vector<31x16xf32>
    %3 = tpu.concatenate %1, %2 in 0 : vector<1x16xf32>, vector<31x16xf32> -> vector<32x16xf32>
    %c0_1 = arith.constant 0 : index
    %c0_2 = arith.constant 0 : index
    %4 = vector.load %arg6[%c0_1, %c0_2] : memref<32x1xf32, #tpu.memory_space<vmem>>, vector<32x1xf32>
    %5 = vector.broadcast %4 : vector<32x1xf32> to vector<32x16xf32>
    %6 = arith.mulf %3, %5 : vector<32x16xf32>
    %7 = vector.extract_strided_slice %0 {offsets = [1, 0], sizes = [31, 16], strides = [1, 1]} : vector<32x16xf32> to vector<31x16xf32>
    %8 = tpu.concatenate %7, %1 in 0 : vector<31x16xf32>, vector<1x16xf32> -> vector<32x16xf32>
    %c0_3 = arith.constant 0 : index
    %c0_4 = arith.constant 0 : index
    %9 = vector.load %arg7[%c0_3, %c0_4] : memref<32x1xf32, #tpu.memory_space<vmem>>, vector<32x1xf32>
    %10 = vector.broadcast %9 : vector<32x1xf32> to vector<32x16xf32>
    %11 = arith.mulf %8, %10 : vector<32x16xf32>
    %c0_5 = arith.constant 0 : index
    %c0_6 = arith.constant 0 : index
    %12 = vector.load %arg3[%c0_5, %c0_6] : memref<1x64xf32, #tpu.memory_space<vmem>>, vector<1x64xf32>
    %13 = arith.truncf %6 : vector<32x16xf32> to vector<32x16xbf16>
    %c0_7 = arith.constant 0 : index
    %c0_8 = arith.constant 0 : index
    %14 = vector.load %arg2[%c0_7, %c0_8] : memref<48x64xbf16, #tpu.memory_space<vmem>>, vector<16x64xbf16>
    %cst_9 = arith.constant dense<0.000000e+00> : vector<32x64xf32>
    %15 = tpu.matmul %13, %14, %cst_9 {dimension_numbers = #tpu.dot_dimension_numbers<[1], [0], [0], [1], [0, 0, 1, 1], [], []>} : vector<32x16xbf16>, vector<16x64xbf16>, vector<32x64xf32> -> vector<32x64xf32>
    %16 = vector.broadcast %12 : vector<1x64xf32> to vector<32x64xf32>
    %17 = arith.addf %16, %15 : vector<32x64xf32>
    %18 = arith.truncf %0 : vector<32x16xf32> to vector<32x16xbf16>
    %c16 = arith.constant 16 : index
    %c0_10 = arith.constant 0 : index
    %19 = vector.load %arg2[%c16, %c0_10] : memref<48x64xbf16, #tpu.memory_space<vmem>>, vector<16x64xbf16>
    %cst_11 = arith.constant dense<0.000000e+00> : vector<32x64xf32>
    %20 = tpu.matmul %18, %19, %cst_11 {dimension_numbers = #tpu.dot_dimension_numbers<[1], [0], [0], [1], [0, 0, 1, 1], [], []>} : vector<32x16xbf16>, vector<16x64xbf16>, vector<32x64xf32> -> vector<32x64xf32>
    %21 = arith.addf %17, %20 : vector<32x64xf32>
    %22 = arith.truncf %11 : vector<32x16xf32> to vector<32x16xbf16>
    %c32 = arith.constant 32 : index
    %c0_12 = arith.constant 0 : index
    %23 = vector.load %arg2[%c32, %c0_12] : memref<48x64xbf16, #tpu.memory_space<vmem>>, vector<16x64xbf16>
    %cst_13 = arith.constant dense<0.000000e+00> : vector<32x64xf32>
    %24 = tpu.matmul %22, %23, %cst_13 {dimension_numbers = #tpu.dot_dimension_numbers<[1], [0], [0], [1], [0, 0, 1, 1], [], []>} : vector<32x16xbf16>, vector<16x64xbf16>, vector<32x64xf32> -> vector<32x64xf32>
    %25 = arith.addf %21, %24 : vector<32x64xf32>
    %cst_14 = arith.constant 0.000000e+00 : f32
    %26 = vector.broadcast %cst_14 : f32 to vector<32x64xf32>
    %27 = arith.maximumf %25, %26 : vector<32x64xf32>
    %c0_15 = arith.constant 0 : index
    %c0_16 = arith.constant 0 : index
    %28 = vector.load %arg31[%c0_15, %c0_16] : memref<32x64xf32, #tpu.memory_space<vmem>>, vector<32x64xf32>
    tpu.vector_store %arg31[%c0_15, %c0_16], %27 {strides = array<i32>} : memref<32x64xf32, #tpu.memory_space<vmem>>, vector<32x64xf32>,
    %c0_17 = arith.constant 0 : index
    %c0_18 = arith.constant 0 : index
    %29 = tpu.strided_load %arg31[%c0_17, %c0_18] {strides = array<i32: 2, 1>} : memref<32x64xf32, #tpu.memory_space<vmem>>, vector<16x64xf32>
    %c1 = arith.constant 1 : index
    %c0_19 = arith.constant 0 : index
    %30 = tpu.strided_load %arg31[%c1, %c0_19] {strides = array<i32: 2, 1>} : memref<32x64xf32, #tpu.memory_space<vmem>>, vector<16x64xf32>
    %31 = arith.maximumf %29, %30 : vector<16x64xf32>
    %32 = arith.truncf %31 : vector<16x64xf32> to vector<16x64xbf16>
    %c0_20 = arith.constant 0 : index
    %c0_21 = arith.constant 0 : index
    %33 = vector.load %arg4[%c0_20, %c0_21] : memref<64x32xbf16, #tpu.memory_space<vmem>>, vector<64x32xbf16>
    %cst_22 = arith.constant dense<0.000000e+00> : vector<16x32xf32>
    %34 = tpu.matmul %32, %33, %cst_22 {dimension_numbers = #tpu.dot_dimension_numbers<[1], [0], [0], [1], [0, 0, 1, 1], [], []>} : vector<16x64xbf16>, vector<64x32xbf16>, vector<16x32xf32> -> vector<16x32xf32>
    %c0_23 = arith.constant 0 : index
    %c0_24 = arith.constant 0 : index
    %35 = vector.load %arg5[%c0_23, %c0_24] : memref<64x32xbf16, #tpu.memory_space<vmem>>, vector<64x32xbf16>
    %cst_25 = arith.constant dense<0.000000e+00> : vector<16x32xf32>
    %36 = tpu.matmul %32, %35, %cst_25 {dimension_numbers = #tpu.dot_dimension_numbers<[1], [0], [0], [1], [0, 0, 1, 1], [], []>} : vector<16x64xbf16>, vector<64x32xbf16>, vector<16x32xf32> -> vector<16x32xf32>
    %37 = arith.maximumf %34, %36 : vector<16x32xf32>
    %cst_26 = arith.constant 0.000000e+00 : f32
    %38 = vector.broadcast %cst_26 : f32 to vector<1x32xf32>
    %39 = vector.extract_strided_slice %37 {offsets = [0, 0], sizes = [15, 32], strides = [1, 1]} : vector<16x32xf32> to vector<15x32xf32>
    %40 = tpu.concatenate %38, %39 in 0 : vector<1x32xf32>, vector<15x32xf32> -> vector<16x32xf32>
    %c0_27 = arith.constant 0 : index
    %c0_28 = arith.constant 0 : index
    %41 = vector.load %arg12[%c0_27, %c0_28] : memref<16x1xf32, #tpu.memory_space<vmem>>, vector<16x1xf32>
    %42 = vector.broadcast %41 : vector<16x1xf32> to vector<16x32xf32>
    %43 = arith.mulf %40, %42 : vector<16x32xf32>
    %44 = vector.extract_strided_slice %37 {offsets = [1, 0], sizes = [15, 32], strides = [1, 1]} : vector<16x32xf32> to vector<15x32xf32>
    %45 = tpu.concatenate %44, %38 in 0 : vector<15x32xf32>, vector<1x32xf32> -> vector<16x32xf32>
    %c0_29 = arith.constant 0 : index
    %c0_30 = arith.constant 0 : index
    %46 = vector.load %arg13[%c0_29, %c0_30] : memref<16x1xf32, #tpu.memory_space<vmem>>, vector<16x1xf32>
    %47 = vector.broadcast %46 : vector<16x1xf32> to vector<16x32xf32>
    %48 = arith.mulf %45, %47 : vector<16x32xf32>
    %c0_31 = arith.constant 0 : index
    %c0_32 = arith.constant 0 : index
    %49 = vector.load %arg9[%c0_31, %c0_32] : memref<1x64xf32, #tpu.memory_space<vmem>>, vector<1x64xf32>
    %50 = arith.truncf %43 : vector<16x32xf32> to vector<16x32xbf16>
    %c0_33 = arith.constant 0 : index
    %c0_34 = arith.constant 0 : index
    %51 = vector.load %arg8[%c0_33, %c0_34] : memref<96x64xbf16, #tpu.memory_space<vmem>>, vector<32x64xbf16>
    %cst_35 = arith.constant dense<0.000000e+00> : vector<16x64xf32>
    %52 = tpu.matmul %50, %51, %cst_35 {dimension_numbers = #tpu.dot_dimension_numbers<[1], [0], [0], [1], [0, 0, 1, 1], [], []>} : vector<16x32xbf16>, vector<32x64xbf16>, vector<16x64xf32> -> vector<16x64xf32>
    %53 = vector.broadcast %49 : vector<1x64xf32> to vector<16x64xf32>
    %54 = arith.addf %53, %52 : vector<16x64xf32>
    %55 = arith.truncf %37 : vector<16x32xf32> to vector<16x32xbf16>
    %c32_36 = arith.constant 32 : index
    %c0_37 = arith.constant 0 : index
    %56 = vector.load %arg8[%c32_36, %c0_37] : memref<96x64xbf16, #tpu.memory_space<vmem>>, vector<32x64xbf16>
    %cst_38 = arith.constant dense<0.000000e+00> : vector<16x64xf32>
    %57 = tpu.matmul %55, %56, %cst_38 {dimension_numbers = #tpu.dot_dimension_numbers<[1], [0], [0], [1], [0, 0, 1, 1], [], []>} : vector<16x32xbf16>, vector<32x64xbf16>, vector<16x64xf32> -> vector<16x64xf32>
    %58 = arith.addf %54, %57 : vector<16x64xf32>
    %59 = arith.truncf %48 : vector<16x32xf32> to vector<16x32xbf16>
    %c64 = arith.constant 64 : index
    %c0_39 = arith.constant 0 : index
    %60 = vector.load %arg8[%c64, %c0_39] : memref<96x64xbf16, #tpu.memory_space<vmem>>, vector<32x64xbf16>
    %cst_40 = arith.constant dense<0.000000e+00> : vector<16x64xf32>
    %61 = tpu.matmul %59, %60, %cst_40 {dimension_numbers = #tpu.dot_dimension_numbers<[1], [0], [0], [1], [0, 0, 1, 1], [], []>} : vector<16x32xbf16>, vector<32x64xbf16>, vector<16x64xf32> -> vector<16x64xf32>
    %62 = arith.addf %58, %61 : vector<16x64xf32>
    %cst_41 = arith.constant 0.000000e+00 : f32
    %63 = vector.broadcast %cst_41 : f32 to vector<16x64xf32>
    %64 = arith.maximumf %62, %63 : vector<16x64xf32>
    %c0_42 = arith.constant 0 : index
    %c0_43 = arith.constant 0 : index
    %65 = vector.load %arg32[%c0_42, %c0_43] : memref<16x64xf32, #tpu.memory_space<vmem>>, vector<16x64xf32>
    tpu.vector_store %arg32[%c0_42, %c0_43], %64 {strides = array<i32>} : memref<16x64xf32, #tpu.memory_space<vmem>>, vector<16x64xf32>,
    %c0_44 = arith.constant 0 : index
    %c0_45 = arith.constant 0 : index
    %66 = tpu.strided_load %arg32[%c0_44, %c0_45] {strides = array<i32: 2, 1>} : memref<16x64xf32, #tpu.memory_space<vmem>>, vector<8x64xf32>
    %c1_46 = arith.constant 1 : index
    %c0_47 = arith.constant 0 : index
    %67 = tpu.strided_load %arg32[%c1_46, %c0_47] {strides = array<i32: 2, 1>} : memref<16x64xf32, #tpu.memory_space<vmem>>, vector<8x64xf32>
    %68 = arith.maximumf %66, %67 : vector<8x64xf32>
    %69 = arith.truncf %68 : vector<8x64xf32> to vector<8x64xbf16>
    %c0_48 = arith.constant 0 : index
    %c0_49 = arith.constant 0 : index
    %70 = vector.load %arg10[%c0_48, %c0_49] : memref<64x32xbf16, #tpu.memory_space<vmem>>, vector<64x32xbf16>
    %cst_50 = arith.constant dense<0.000000e+00> : vector<8x32xf32>
    %71 = tpu.matmul %69, %70, %cst_50 {dimension_numbers = #tpu.dot_dimension_numbers<[1], [0], [0], [1], [0, 0, 1, 1], [], []>} : vector<8x64xbf16>, vector<64x32xbf16>, vector<8x32xf32> -> vector<8x32xf32>
    %c0_51 = arith.constant 0 : index
    %c0_52 = arith.constant 0 : index
    %72 = vector.load %arg11[%c0_51, %c0_52] : memref<64x32xbf16, #tpu.memory_space<vmem>>, vector<64x32xbf16>
    %cst_53 = arith.constant dense<0.000000e+00> : vector<8x32xf32>
    %73 = tpu.matmul %69, %72, %cst_53 {dimension_numbers = #tpu.dot_dimension_numbers<[1], [0], [0], [1], [0, 0, 1, 1], [], []>} : vector<8x64xbf16>, vector<64x32xbf16>, vector<8x32xf32> -> vector<8x32xf32>
    %74 = arith.maximumf %71, %73 : vector<8x32xf32>
    %cst_54 = arith.constant 0.000000e+00 : f32
    %75 = vector.broadcast %cst_54 : f32 to vector<1x32xf32>
    %76 = vector.extract_strided_slice %74 {offsets = [0, 0], sizes = [7, 32], strides = [1, 1]} : vector<8x32xf32> to vector<7x32xf32>
    %77 = tpu.concatenate %75, %76 in 0 : vector<1x32xf32>, vector<7x32xf32> -> vector<8x32xf32>
    %c0_55 = arith.constant 0 : index
    %c0_56 = arith.constant 0 : index
    %78 = vector.load %arg18[%c0_55, %c0_56] : memref<8x1xf32, #tpu.memory_space<vmem>>, vector<8x1xf32>
    %79 = vector.broadcast %78 : vector<8x1xf32> to vector<8x32xf32>
    %80 = arith.mulf %77, %79 : vector<8x32xf32>
    %81 = vector.extract_strided_slice %74 {offsets = [1, 0], sizes = [7, 32], strides = [1, 1]} : vector<8x32xf32> to vector<7x32xf32>
    %82 = tpu.concatenate %81, %75 in 0 : vector<7x32xf32>, vector<1x32xf32> -> vector<8x32xf32>
    %c0_57 = arith.constant 0 : index
    %c0_58 = arith.constant 0 : index
    %83 = vector.load %arg19[%c0_57, %c0_58] : memref<8x1xf32, #tpu.memory_space<vmem>>, vector<8x1xf32>
    %84 = vector.broadcast %83 : vector<8x1xf32> to vector<8x32xf32>
    %85 = arith.mulf %82, %84 : vector<8x32xf32>
    %c0_59 = arith.constant 0 : index
    %c0_60 = arith.constant 0 : index
    %86 = vector.load %arg15[%c0_59, %c0_60] : memref<1x64xf32, #tpu.memory_space<vmem>>, vector<1x64xf32>
    %87 = arith.truncf %80 : vector<8x32xf32> to vector<8x32xbf16>
    %c0_61 = arith.constant 0 : index
    %c0_62 = arith.constant 0 : index
    %88 = vector.load %arg14[%c0_61, %c0_62] : memref<96x64xbf16, #tpu.memory_space<vmem>>, vector<32x64xbf16>
    %cst_63 = arith.constant dense<0.000000e+00> : vector<8x64xf32>
    %89 = tpu.matmul %87, %88, %cst_63 {dimension_numbers = #tpu.dot_dimension_numbers<[1], [0], [0], [1], [0, 0, 1, 1], [], []>} : vector<8x32xbf16>, vector<32x64xbf16>, vector<8x64xf32> -> vector<8x64xf32>
    %90 = vector.broadcast %86 : vector<1x64xf32> to vector<8x64xf32>
    %91 = arith.addf %90, %89 : vector<8x64xf32>
    %92 = arith.truncf %74 : vector<8x32xf32> to vector<8x32xbf16>
    %c32_64 = arith.constant 32 : index
    %c0_65 = arith.constant 0 : index
    %93 = vector.load %arg14[%c32_64, %c0_65] : memref<96x64xbf16, #tpu.memory_space<vmem>>, vector<32x64xbf16>
    %cst_66 = arith.constant dense<0.000000e+00> : vector<8x64xf32>
    %94 = tpu.matmul %92, %93, %cst_66 {dimension_numbers = #tpu.dot_dimension_numbers<[1], [0], [0], [1], [0, 0, 1, 1], [], []>} : vector<8x32xbf16>, vector<32x64xbf16>, vector<8x64xf32> -> vector<8x64xf32>
    %95 = arith.addf %91, %94 : vector<8x64xf32>
    %96 = arith.truncf %85 : vector<8x32xf32> to vector<8x32xbf16>
    %c64_67 = arith.constant 64 : index
    %c0_68 = arith.constant 0 : index
    %97 = vector.load %arg14[%c64_67, %c0_68] : memref<96x64xbf16, #tpu.memory_space<vmem>>, vector<32x64xbf16>
    %cst_69 = arith.constant dense<0.000000e+00> : vector<8x64xf32>
    %98 = tpu.matmul %96, %97, %cst_69 {dimension_numbers = #tpu.dot_dimension_numbers<[1], [0], [0], [1], [0, 0, 1, 1], [], []>} : vector<8x32xbf16>, vector<32x64xbf16>, vector<8x64xf32> -> vector<8x64xf32>
    %99 = arith.addf %95, %98 : vector<8x64xf32>
    %cst_70 = arith.constant 0.000000e+00 : f32
    %100 = vector.broadcast %cst_70 : f32 to vector<8x64xf32>
    %101 = arith.maximumf %99, %100 : vector<8x64xf32>
    %c0_71 = arith.constant 0 : index
    %c0_72 = arith.constant 0 : index
    %102 = vector.load %arg33[%c0_71, %c0_72] : memref<8x64xf32, #tpu.memory_space<vmem>>, vector<8x64xf32>
    tpu.vector_store %arg33[%c0_71, %c0_72], %101 {strides = array<i32>} : memref<8x64xf32, #tpu.memory_space<vmem>>, vector<8x64xf32>,
    %c0_73 = arith.constant 0 : index
    %c0_74 = arith.constant 0 : index
    %103 = tpu.strided_load %arg33[%c0_73, %c0_74] {strides = array<i32: 2, 1>} : memref<8x64xf32, #tpu.memory_space<vmem>>, vector<4x64xf32>
    %c1_75 = arith.constant 1 : index
    %c0_76 = arith.constant 0 : index
    %104 = tpu.strided_load %arg33[%c1_75, %c0_76] {strides = array<i32: 2, 1>} : memref<8x64xf32, #tpu.memory_space<vmem>>, vector<4x64xf32>
    %105 = arith.maximumf %103, %104 : vector<4x64xf32>
    %106 = arith.truncf %105 : vector<4x64xf32> to vector<4x64xbf16>
    %c0_77 = arith.constant 0 : index
    %c0_78 = arith.constant 0 : index
    %107 = vector.load %arg16[%c0_77, %c0_78] : memref<64x32xbf16, #tpu.memory_space<vmem>>, vector<64x32xbf16>
    %cst_79 = arith.constant dense<0.000000e+00> : vector<4x32xf32>
    %108 = tpu.matmul %106, %107, %cst_79 {dimension_numbers = #tpu.dot_dimension_numbers<[1], [0], [0], [1], [0, 0, 1, 1], [], []>} : vector<4x64xbf16>, vector<64x32xbf16>, vector<4x32xf32> -> vector<4x32xf32>
    %c0_80 = arith.constant 0 : index
    %c0_81 = arith.constant 0 : index
    %109 = vector.load %arg17[%c0_80, %c0_81] : memref<64x32xbf16, #tpu.memory_space<vmem>>, vector<64x32xbf16>
    %cst_82 = arith.constant dense<0.000000e+00> : vector<4x32xf32>
    %110 = tpu.matmul %106, %109, %cst_82 {dimension_numbers = #tpu.dot_dimension_numbers<[1], [0], [0], [1], [0, 0, 1, 1], [], []>} : vector<4x64xbf16>, vector<64x32xbf16>, vector<4x32xf32> -> vector<4x32xf32>
    %111 = arith.maximumf %108, %110 : vector<4x32xf32>
    %cst_83 = arith.constant 0.000000e+00 : f32
    %112 = vector.broadcast %cst_83 : f32 to vector<1x32xf32>
    %113 = vector.extract_strided_slice %111 {offsets = [0, 0], sizes = [3, 32], strides = [1, 1]} : vector<4x32xf32> to vector<3x32xf32>
    %114 = tpu.concatenate %112, %113 in 0 : vector<1x32xf32>, vector<3x32xf32> -> vector<4x32xf32>
    %c0_84 = arith.constant 0 : index
    %c0_85 = arith.constant 0 : index
    %115 = vector.load %arg24[%c0_84, %c0_85] : memref<4x1xf32, #tpu.memory_space<vmem>>, vector<4x1xf32>
    %116 = vector.broadcast %115 : vector<4x1xf32> to vector<4x32xf32>
    %117 = arith.mulf %114, %116 : vector<4x32xf32>
    %118 = vector.extract_strided_slice %111 {offsets = [1, 0], sizes = [3, 32], strides = [1, 1]} : vector<4x32xf32> to vector<3x32xf32>
    %119 = tpu.concatenate %118, %112 in 0 : vector<3x32xf32>, vector<1x32xf32> -> vector<4x32xf32>
    %c0_86 = arith.constant 0 : index
    %c0_87 = arith.constant 0 : index
    %120 = vector.load %arg25[%c0_86, %c0_87] : memref<4x1xf32, #tpu.memory_space<vmem>>, vector<4x1xf32>
    %121 = vector.broadcast %120 : vector<4x1xf32> to vector<4x32xf32>
    %122 = arith.mulf %119, %121 : vector<4x32xf32>
    %c0_88 = arith.constant 0 : index
    %c0_89 = arith.constant 0 : index
    %123 = vector.load %arg21[%c0_88, %c0_89] : memref<1x64xf32, #tpu.memory_space<vmem>>, vector<1x64xf32>
    %124 = arith.truncf %117 : vector<4x32xf32> to vector<4x32xbf16>
    %c0_90 = arith.constant 0 : index
    %c0_91 = arith.constant 0 : index
    %125 = vector.load %arg20[%c0_90, %c0_91] : memref<96x64xbf16, #tpu.memory_space<vmem>>, vector<32x64xbf16>
    %cst_92 = arith.constant dense<0.000000e+00> : vector<4x64xf32>
    %126 = tpu.matmul %124, %125, %cst_92 {dimension_numbers = #tpu.dot_dimension_numbers<[1], [0], [0], [1], [0, 0, 1, 1], [], []>} : vector<4x32xbf16>, vector<32x64xbf16>, vector<4x64xf32> -> vector<4x64xf32>
    %127 = vector.broadcast %123 : vector<1x64xf32> to vector<4x64xf32>
    %128 = arith.addf %127, %126 : vector<4x64xf32>
    %129 = arith.truncf %111 : vector<4x32xf32> to vector<4x32xbf16>
    %c32_93 = arith.constant 32 : index
    %c0_94 = arith.constant 0 : index
    %130 = vector.load %arg20[%c32_93, %c0_94] : memref<96x64xbf16, #tpu.memory_space<vmem>>, vector<32x64xbf16>
    %cst_95 = arith.constant dense<0.000000e+00> : vector<4x64xf32>
    %131 = tpu.matmul %129, %130, %cst_95 {dimension_numbers = #tpu.dot_dimension_numbers<[1], [0], [0], [1], [0, 0, 1, 1], [], []>} : vector<4x32xbf16>, vector<32x64xbf16>, vector<4x64xf32> -> vector<4x64xf32>
    %132 = arith.addf %128, %131 : vector<4x64xf32>
    %133 = arith.truncf %122 : vector<4x32xf32> to vector<4x32xbf16>
    %c64_96 = arith.constant 64 : index
    %c0_97 = arith.constant 0 : index
    %134 = vector.load %arg20[%c64_96, %c0_97] : memref<96x64xbf16, #tpu.memory_space<vmem>>, vector<32x64xbf16>
    %cst_98 = arith.constant dense<0.000000e+00> : vector<4x64xf32>
    %135 = tpu.matmul %133, %134, %cst_98 {dimension_numbers = #tpu.dot_dimension_numbers<[1], [0], [0], [1], [0, 0, 1, 1], [], []>} : vector<4x32xbf16>, vector<32x64xbf16>, vector<4x64xf32> -> vector<4x64xf32>
    %136 = arith.addf %132, %135 : vector<4x64xf32>
    %cst_99 = arith.constant 0.000000e+00 : f32
    %137 = vector.broadcast %cst_99 : f32 to vector<4x64xf32>
    %138 = arith.maximumf %136, %137 : vector<4x64xf32>
    %c0_100 = arith.constant 0 : index
    %c0_101 = arith.constant 0 : index
    %139 = vector.load %arg34[%c0_100, %c0_101] : memref<4x64xf32, #tpu.memory_space<vmem>>, vector<4x64xf32>
    tpu.vector_store %arg34[%c0_100, %c0_101], %138 {strides = array<i32>} : memref<4x64xf32, #tpu.memory_space<vmem>>, vector<4x64xf32>,
    %c0_102 = arith.constant 0 : index
    %c0_103 = arith.constant 0 : index
    %140 = tpu.strided_load %arg34[%c0_102, %c0_103] {strides = array<i32: 2, 1>} : memref<4x64xf32, #tpu.memory_space<vmem>>, vector<2x64xf32>
    %c1_104 = arith.constant 1 : index
    %c0_105 = arith.constant 0 : index
    %141 = tpu.strided_load %arg34[%c1_104, %c0_105] {strides = array<i32: 2, 1>} : memref<4x64xf32, #tpu.memory_space<vmem>>, vector<2x64xf32>
    %142 = arith.maximumf %140, %141 : vector<2x64xf32>
    %143 = arith.truncf %142 : vector<2x64xf32> to vector<2x64xbf16>
    %c0_106 = arith.constant 0 : index
    %c0_107 = arith.constant 0 : index
    %144 = vector.load %arg22[%c0_106, %c0_107] : memref<64x32xbf16, #tpu.memory_space<vmem>>, vector<64x32xbf16>
    %cst_108 = arith.constant dense<0.000000e+00> : vector<2x32xf32>
    %145 = tpu.matmul %143, %144, %cst_108 {dimension_numbers = #tpu.dot_dimension_numbers<[1], [0], [0], [1], [0, 0, 1, 1], [], []>} : vector<2x64xbf16>, vector<64x32xbf16>, vector<2x32xf32> -> vector<2x32xf32>
    %c0_109 = arith.constant 0 : index
    %c0_110 = arith.constant 0 : index
    %146 = vector.load %arg23[%c0_109, %c0_110] : memref<64x32xbf16, #tpu.memory_space<vmem>>, vector<64x32xbf16>
    %cst_111 = arith.constant dense<0.000000e+00> : vector<2x32xf32>
    %147 = tpu.matmul %143, %146, %cst_111 {dimension_numbers = #tpu.dot_dimension_numbers<[1], [0], [0], [1], [0, 0, 1, 1], [], []>} : vector<2x64xbf16>, vector<64x32xbf16>, vector<2x32xf32> -> vector<2x32xf32>
    %148 = arith.maximumf %145, %147 : vector<2x32xf32>
    %149 = arith.truncf %148 : vector<2x32xf32> to vector<2x32xbf16>
    %c0_112 = arith.constant 0 : index
    %c0_113 = arith.constant 0 : index
    %150 = vector.load %arg26[%c0_112, %c0_113] : memref<32x512xbf16, #tpu.memory_space<vmem>>, vector<32x512xbf16>
    %cst_114 = arith.constant dense<0.000000e+00> : vector<2x512xf32>
    %151 = tpu.matmul %149, %150, %cst_114 {dimension_numbers = #tpu.dot_dimension_numbers<[1], [0], [0], [1], [0, 0, 1, 1], [], []>} : vector<2x32xbf16>, vector<32x512xbf16>, vector<2x512xf32> -> vector<2x512xf32>
    %c0_115 = arith.constant 0 : index
    %c0_116 = arith.constant 0 : index
    %152 = vector.load %arg27[%c0_115, %c0_116] : memref<1x512xf32, #tpu.memory_space<vmem>>, vector<1x512xf32>
    %153 = vector.broadcast %152 : vector<1x512xf32> to vector<2x512xf32>
    %154 = arith.addf %151, %153 : vector<2x512xf32>
    %cst_117 = arith.constant 0.000000e+00 : f32
    %155 = vector.broadcast %cst_117 : f32 to vector<2x512xf32>
    %156 = arith.maximumf %154, %155 : vector<2x512xf32>
    %157 = arith.truncf %156 : vector<2x512xf32> to vector<2x512xbf16>
    %c0_118 = arith.constant 0 : index
    %c0_119 = arith.constant 0 : index
    %158 = vector.load %arg28[%c0_118, %c0_119] : memref<512x128xbf16, #tpu.memory_space<vmem>>, vector<512x128xbf16>
    %cst_120 = arith.constant dense<0.000000e+00> : vector<2x128xf32>
    %159 = tpu.matmul %157, %158, %cst_120 {dimension_numbers = #tpu.dot_dimension_numbers<[1], [0], [0], [1], [0, 0, 1, 1], [], []>} : vector<2x512xbf16>, vector<512x128xbf16>, vector<2x128xf32> -> vector<2x128xf32>
    %c0_121 = arith.constant 0 : index
    %c0_122 = arith.constant 0 : index
    %160 = vector.load %arg29[%c0_121, %c0_122] : memref<1x128xf32, #tpu.memory_space<vmem>>, vector<1x128xf32>
    %161 = vector.broadcast %160 : vector<1x128xf32> to vector<2x128xf32>
    %162 = arith.addf %159, %161 : vector<2x128xf32>
    %cst_123 = arith.constant 0.000000e+00 : f32
    %163 = vector.broadcast %cst_123 : f32 to vector<2x128xf32>
    %164 = arith.maximumf %162, %163 : vector<2x128xf32>
    %c0_124 = arith.constant 0 : index
    %c0_125 = arith.constant 0 : index
    %165 = vector.load %arg30[%c0_124, %c0_125] : memref<2x128xf32, #tpu.memory_space<vmem>>, vector<2x128xf32>
    tpu.vector_store %arg30[%c0_124, %c0_125], %164 {strides = array<i32>} : memref<2x128xf32, #tpu.memory_space<vmem>>, vector<2x128xf32>,
    return
  }
  func.func @transform_0(%arg0: i32) -> (i32, i32) {
    %c0_i32 = arith.constant 0 : i32
    %c0_i32_0 = arith.constant 0 : i32
    return %arg0, %c0_i32 : i32, i32
  }
  func.func @transform_1(%arg0: i32) -> (i32, i32) {
    %c0_i32 = arith.constant 0 : i32
    %c0_i32_0 = arith.constant 0 : i32
    %c0_i32_1 = arith.constant 0 : i32
    return %c0_i32, %c0_i32_0 : i32, i32
  }
  func.func @transform_2(%arg0: i32) -> (i32, i32) {
    %c0_i32 = arith.constant 0 : i32
    %c0_i32_0 = arith.constant 0 : i32
    %c0_i32_1 = arith.constant 0 : i32
    return %c0_i32, %c0_i32_0 : i32, i32
  }
  func.func @transform_3(%arg0: i32) -> (i32, i32) {
    %c0_i32 = arith.constant 0 : i32
    %c0_i32_0 = arith.constant 0 : i32
    %c0_i32_1 = arith.constant 0 : i32
    return %c0_i32, %c0_i32_0 : i32, i32
  }
  func.func @transform_4(%arg0: i32) -> (i32, i32) {
    %c0_i32 = arith.constant 0 : i32
    %c0_i32_0 = arith.constant 0 : i32
    %c0_i32_1 = arith.constant 0 : i32
    return %c0_i32, %c0_i32_0 : i32, i32
  }
  func.func @transform_5(%arg0: i32) -> (i32, i32) {
    %c0_i32 = arith.constant 0 : i32
    %c0_i32_0 = arith.constant 0 : i32
    %c0_i32_1 = arith.constant 0 : i32
    return %c0_i32, %c0_i32_0 : i32, i32
  }
  func.func @transform_6(%arg0: i32) -> (i32, i32) {
    %c0_i32 = arith.constant 0 : i32
    %c0_i32_0 = arith.constant 0 : i32
    %c0_i32_1 = arith.constant 0 : i32
    return %c0_i32, %c0_i32_0 : i32, i32
  }
  func.func @transform_7(%arg0: i32) -> (i32, i32) {
    %c0_i32 = arith.constant 0 : i32
    %c0_i32_0 = arith.constant 0 : i32
    %c0_i32_1 = arith.constant 0 : i32
    return %c0_i32, %c0_i32_0 : i32, i32
  }
  func.func @transform_8(%arg0: i32) -> (i32, i32) {
    %c0_i32 = arith.constant 0 : i32
    %c0_i32_0 = arith.constant 0 : i32
    %c0_i32_1 = arith.constant 0 : i32
    return %c0_i32, %c0_i32_0 : i32, i32
  }
  func.func @transform_9(%arg0: i32) -> (i32, i32) {
    %c0_i32 = arith.constant 0 : i32
    %c0_i32_0 = arith.constant 0 : i32
    %c0_i32_1 = arith.constant 0 : i32
    return %c0_i32, %c0_i32_0 : i32, i32
  }
  func.func @transform_10(%arg0: i32) -> (i32, i32) {
    %c0_i32 = arith.constant 0 : i32
    %c0_i32_0 = arith.constant 0 : i32
    %c0_i32_1 = arith.constant 0 : i32
    return %c0_i32, %c0_i32_0 : i32, i32
  }
  func.func @transform_11(%arg0: i32) -> (i32, i32) {
    %c0_i32 = arith.constant 0 : i32
    %c0_i32_0 = arith.constant 0 : i32
    %c0_i32_1 = arith.constant 0 : i32
    return %c0_i32, %c0_i32_0 : i32, i32
  }
  func.func @transform_12(%arg0: i32) -> (i32, i32) {
    %c0_i32 = arith.constant 0 : i32
    %c0_i32_0 = arith.constant 0 : i32
    %c0_i32_1 = arith.constant 0 : i32
    return %c0_i32, %c0_i32_0 : i32, i32
  }
  func.func @transform_13(%arg0: i32) -> (i32, i32) {
    %c0_i32 = arith.constant 0 : i32
    %c0_i32_0 = arith.constant 0 : i32
    %c0_i32_1 = arith.constant 0 : i32
    return %c0_i32, %c0_i32_0 : i32, i32
  }
  func.func @transform_14(%arg0: i32) -> (i32, i32) {
    %c0_i32 = arith.constant 0 : i32
    %c0_i32_0 = arith.constant 0 : i32
    %c0_i32_1 = arith.constant 0 : i32
    return %c0_i32, %c0_i32_0 : i32, i32
  }
  func.func @transform_15(%arg0: i32) -> (i32, i32) {
    %c0_i32 = arith.constant 0 : i32
    %c0_i32_0 = arith.constant 0 : i32
    %c0_i32_1 = arith.constant 0 : i32
    return %c0_i32, %c0_i32_0 : i32, i32
  }
  func.func @transform_16(%arg0: i32) -> (i32, i32) {
    %c0_i32 = arith.constant 0 : i32
    %c0_i32_0 = arith.constant 0 : i32
    %c0_i32_1 = arith.constant 0 : i32
    return %c0_i32, %c0_i32_0 : i32, i32
  }
  func.func @transform_17(%arg0: i32) -> (i32, i32) {
    %c0_i32 = arith.constant 0 : i32
    %c0_i32_0 = arith.constant 0 : i32
    %c0_i32_1 = arith.constant 0 : i32
    return %c0_i32, %c0_i32_0 : i32, i32
  }
  func.func @transform_18(%arg0: i32) -> (i32, i32) {
    %c0_i32 = arith.constant 0 : i32
    %c0_i32_0 = arith.constant 0 : i32
    %c0_i32_1 = arith.constant 0 : i32
    return %c0_i32, %c0_i32_0 : i32, i32
  }
  func.func @transform_19(%arg0: i32) -> (i32, i32) {
    %c0_i32 = arith.constant 0 : i32
    %c0_i32_0 = arith.constant 0 : i32
    %c0_i32_1 = arith.constant 0 : i32
    return %c0_i32, %c0_i32_0 : i32, i32
  }
  func.func @transform_20(%arg0: i32) -> (i32, i32) {
    %c0_i32 = arith.constant 0 : i32
    %c0_i32_0 = arith.constant 0 : i32
    %c0_i32_1 = arith.constant 0 : i32
    return %c0_i32, %c0_i32_0 : i32, i32
  }
  func.func @transform_21(%arg0: i32) -> (i32, i32) {
    %c0_i32 = arith.constant 0 : i32
    %c0_i32_0 = arith.constant 0 : i32
    %c0_i32_1 = arith.constant 0 : i32
    return %c0_i32, %c0_i32_0 : i32, i32
  }
  func.func @transform_22(%arg0: i32) -> (i32, i32) {
    %c0_i32 = arith.constant 0 : i32
    %c0_i32_0 = arith.constant 0 : i32
    %c0_i32_1 = arith.constant 0 : i32
    return %c0_i32, %c0_i32_0 : i32, i32
  }
  func.func @transform_23(%arg0: i32) -> (i32, i32) {
    %c0_i32 = arith.constant 0 : i32
    %c0_i32_0 = arith.constant 0 : i32
    %c0_i32_1 = arith.constant 0 : i32
    return %c0_i32, %c0_i32_0 : i32, i32
  }
  func.func @transform_24(%arg0: i32) -> (i32, i32) {
    %c0_i32 = arith.constant 0 : i32
    %c0_i32_0 = arith.constant 0 : i32
    %c0_i32_1 = arith.constant 0 : i32
    return %c0_i32, %c0_i32_0 : i32, i32
  }
  func.func @transform_25(%arg0: i32) -> (i32, i32) {
    %c0_i32 = arith.constant 0 : i32
    %c0_i32_0 = arith.constant 0 : i32
    %c0_i32_1 = arith.constant 0 : i32
    return %c0_i32, %c0_i32_0 : i32, i32
  }
  func.func @transform_26(%arg0: i32) -> (i32, i32) {
    %c0_i32 = arith.constant 0 : i32
    %c0_i32_0 = arith.constant 0 : i32
    %c0_i32_1 = arith.constant 0 : i32
    return %c0_i32, %c0_i32_0 : i32, i32
  }
  func.func @transform_27(%arg0: i32) -> (i32, i32) {
    %c0_i32 = arith.constant 0 : i32
    %c0_i32_0 = arith.constant 0 : i32
    %c0_i32_1 = arith.constant 0 : i32
    return %c0_i32, %c0_i32_0 : i32, i32
  }
  func.func @transform_28(%arg0: i32) -> (i32, i32) {
    %c0_i32 = arith.constant 0 : i32
    %c0_i32_0 = arith.constant 0 : i32
    %c0_i32_1 = arith.constant 0 : i32
    return %c0_i32, %c0_i32_0 : i32, i32
  }
  func.func @transform_29(%arg0: i32) -> (i32, i32) {
    %c0_i32 = arith.constant 0 : i32
    %c0_i32_0 = arith.constant 0 : i32
    return %arg0, %c0_i32 : i32, i32
  }
}

</mosaic_0001>

<bundles_post_ra>
// kernel: forward.1
= control target key start
LH: loop header
LB: loop body
LE: loop exit
PB: predicated region body
PF: predicated region fallthrough
CT: control target
= control target key end

     0   :  { %s3736_s6 = smov 1   ;;  %s3737_s10 = smov 2   ;;  %s4336_s0 = inlined_call_operand.smem [shape: u32[30], index: -1, kind: input, shape index: {}] }
   0x1   :  { %s3803_s5 = sld [smem:[%s4336_s0]]   ;;  %s3738_s14 = smov 3  }
   0x2   :  { %s3808_s9 = sld [smem:[%s4336_s0 + %s3736_s6]]   ;;  %s3739_s18 = smov 4  }
   0x3   :  { %s3813_s13 = sld [smem:[%s4336_s0 + %s3737_s10]]   ;;  %s3740_s22 = smov 5  }
   0x4   :  { %s3818_s17 = sld [smem:[%s4336_s0 + %s3738_s14]]   ;;  %s3741_s26 = smov 6  }
   0x5   :  { %s3823_s21 = sld [smem:[%s4336_s0 + %s3739_s18]]   ;;  %s3742_s30 = smov 7  }
   0x6   :  { %s3828_s25 = sld [smem:[%s4336_s0 + %s3740_s22]]   ;;  %s3743_s4 = smov 8  }
   0x7   :  { %s3833_s29 = sld [smem:[%s4336_s0 + %s3741_s26]]   ;;  %s3744_s10 = smov 9  }
   0x8   :  { %4348 = sst [smem:[#allocation53_spill]] %s3808_s9  ;;  %s3745_s15 = smov 10  }
   0x9   :  { %s3838_s3 = sld [smem:[%s4336_s0 + %s3742_s30]]   ;;  %s3746_s20 = smov 11  }
   0xa   :  { %s3843_s8 = sld [smem:[%s4336_s0 + %s3743_s4]]   ;;  %s3747_s26 = smov 12  }
   0xb   :  { %s3848_s14 = sld [smem:[%s4336_s0 + %s3744_s10]]   ;;  %s3748_s1 = smov 13  }
   0xc   :  { %s3853_s19 = sld [smem:[%s4336_s0 + %s3745_s15]]   ;;  %s3749_s7 = smov 14  }
   0xd   :  { %s3858_s24 = sld [smem:[%s4336_s0 + %s3746_s20]]   ;;  %s3750_s15 = smov 15  }
   0xe   :  { %s3863_s30 = sld [smem:[%s4336_s0 + %s3747_s26]]   ;;  %s3751_s22 = smov 16  }
   0xf   :  { %4349 = sst [smem:[#allocation54_spill]] %s3838_s3  ;;  %s3752_s28 = smov 17  }
  0x10   :  { %s3868_s6 = sld [smem:[%s4336_s0 + %s3748_s1]]  }
  0x11   :  { %4350 = sst [smem:[#allocation55_spill]] %s3848_s14 }
  0x12   :  { %s3873_s12 = sld [smem:[%s4336_s0 + %s3749_s7]]   ;;  %s3753_s7 = smov 18  }
  0x13   :  { %4351 = sst [smem:[#allocation56_spill]] %s3858_s24 }
  0x14   :  { %s3878_s20 = sld [smem:[%s4336_s0 + %s3750_s15]]   ;;  %s3754_s15 = smov 19  }
  0x15   :  { %s3883_s27 = sld [smem:[%s4336_s0 + %s3751_s22]]   ;;  %s3755_s22 = smov 20  }
  0x16   :  { %4352 = sst [smem:[#allocation57_spill]] %s3868_s6 }
  0x17   :  { %s3888_s4 = sld [smem:[%s4336_s0 + %s3752_s28]]   ;;  %s3756_s28 = smov 21  }
  0x18   :  { %s3893_s9 = sld [smem:[%s4336_s0 + %s3753_s7]]   ;;  %s3757_s7 = smov 22  }
  0x19   :  { %s3903_s6 = sld [smem:[%s4336_s0 + %s3755_s22]]   ;;  %s3759_s22 = smov 24  }
  0x1a   :  { %4353 = sst [smem:[#allocation58_spill]] %s3878_s20 }
  0x1b   :  { %s3898_s20 = sld [smem:[%s4336_s0 + %s3754_s15]]   ;;  %s3758_s15 = smov 23  }
  0x1c   :  { %s3913_s24 = sld [smem:[%s4336_s0 + %s3757_s7]]   ;;  %s3761_s7 = smov 26  }
  0x1d   :  { %4354 = sst [smem:[#allocation59_spill]] %s3888_s4 }
  0x1e   :  { %s3908_s4 = sld [smem:[%s4336_s0 + %s3756_s28]]   ;;  %s3760_s28 = smov 25  }
  0x1f   :  { %4356 = sst [smem:[#allocation61_spill]] %s3903_s6 }
  0x20   :  { %s3923_s6 = sld [smem:[%s4336_s0 + %s3759_s22]]   ;;  %s3763_s22 = smov 28  }
  0x21   :  { %4355 = sst [smem:[#allocation60_spill]] %s3898_s20 }
  0x22   :  { %4357 = sst [smem:[#allocation62_spill]] %s3913_s24 }
  0x23   :  { %s3918_s20 = sld [smem:[%s4336_s0 + %s3758_s15]]   ;;  %s3762_s15 = smov 27  }
  0x24   :  { %s3928_s14 = sld [smem:[%s4336_s0 + %s3760_s28]]   ;;  %s3764_s28 = smov 29  }
  0x25   :  { %s3933_s24 = sld [smem:[%s4336_s0 + %s3761_s7]]  }
  0x26   :  { %4358 = sst [smem:[#allocation63_spill]] %s3923_s6 }
  0x27   :  { %s3938_s3 = sld [smem:[%s4336_s0 + %s3762_s15]]  }
  0x28   :  { %s3943_s6 = sld [smem:[%s4336_s0 + %s3763_s22]]  }
  0x2a   :  { %4359 = sst [smem:[#allocation64_spill]] %s3928_s14 }
  0x2b   :  { %s3948_s14 = sld [smem:[%s4336_s0 + %s3764_s28]]  }
  0x2c   :  { %64 = vsyncpa [#allocation7], 0 }
  0x2d   :  { %65 = vsyncpa [#allocation9], 0 }
  0x2e   :  { %66 = vsyncpa [#allocation12], 0 }
  0x2f   :  { %67 = vsyncpa [#allocation15], 0 }
  0x30   :  { %68 = vsyncpa [#allocation18], 0 }
  0x31   :  { %69 = vsyncpa [#allocation21], 0 }
  0x32   :  { %70 = vsyncpa [#allocation24], 0 }
  0x33   :  { %71 = vsyncpa [#allocation27], 0 }
  0x34   :  { %72 = vsyncpa [#allocation30], 0 }
  0x35   :  { %73 = vsyncpa [#allocation33], 0 }
  0x36   :  { %74 = vsyncpa [#allocation36], 0 }
  0x37   :  { %75 = vsyncpa [#allocation39], 0  ;;  %s3765_s7 = smov [#allocation8]   ;;  %s3206_s0 = scalar_lea.hbm %s3813_s13, 16 }
  0x38   :  { %s96_s10 = sshll.u32 %s3765_s7, 4  ;;  %p3207_p0 = scmp.ne.s32.totalorder %s3813_s13, %s3206_s0  ;;  %s97_s10 = int_to_ptr.vmem [resolvable:$true] %s96_s10 }
  0x39   :  { %p3210_p1 = scmp.lt.u32.totalorder %s3206_s0, %s3813_s13 }
  0x3b   :  { %p3212_p2 = pnand %p3210_p1, %p3207_p0 }
  0x3d   :  { %3215 = shalt.err (!%p3212_p2)
}
  0x3e   :  { %s3216_s11 = scalar_lea.vmem %s97_s10, 16  ;;  %s3220_s15 = scalar_lea.vmem %s97_s10, 32 }
  0x3f   :  { %p3217_p3 = scmp.ne.s32.totalorder %s97_s10, %s3216_s11  ;;  %p3221_p4 = scmp.lt.s32.totalorder %s97_s10, %s97_s10 }
  0x40   :  { %p3222_p5 = scmp.lt.s32.totalorder %s3220_s15, %s3216_s11 }
  0x42   :  { %p3223_p6 = por %p3222_p5, %p3221_p4 }
  0x44   :  { %p3224_p7 = pnand %p3223_p6, %p3217_p3 }
  0x46   :  { %3227 = shalt.err (!%p3224_p7)
}
  0x47   :  { %99 = dma.hbm_to_vmem [thread:$0]  %s3813_s13, 16, %s97_s10, [#allocation9]  }
  0x48   :  { %s3766_s16 = smov [#allocation11]   ;;  %s3228_s22 = scalar_lea.hbm %s3823_s21, 512 }
  0x49   :  { %s117_s18 = sshll.u32 %s3766_s16, 4  ;;  %p3229_p8 = scmp.ne.s32.totalorder %s3823_s21, %s3228_s22  ;;  %s118_s18 = int_to_ptr.vmem [resolvable:$true] %s117_s18 }
  0x4a   :  { %p3232_p9 = scmp.lt.u32.totalorder %s3228_s22, %s3823_s21 }
  0x4c   :  { %p3234_p10 = pnand %p3232_p9, %p3229_p8 }
  0x4e   :  { %3237 = shalt.err (!%p3234_p10)
}
  0x4f   :  { %s3238_s23 = scalar_lea.vmem %s118_s18, 512  ;;  %p3243_p12 = scmp.lt.s32.totalorder %s118_s18, %s118_s18 }
  0x50   :  { %p3239_p11 = scmp.ne.s32.totalorder %s118_s18, %s3238_s23  ;;  %p3244_p13 = scmp.lt.s32.totalorder %s3238_s23, %s3238_s23 }
  0x52   :  { %p3245_p0 = por %p3244_p13, %p3243_p12 }
  0x54   :  { %p3246_p1 = pnand %p3245_p0, %p3239_p11 }
  0x56   :  { %3249 = shalt.err (!%p3246_p1)
}
  0x57   :  { %s3767_s26 = smov 64   ;;  %s3768_s13 = smov 4  }
  0x58   :  { %123 = dma.hbm_to_vmem [thread:$0]  %s3823_s21, 512, %s118_s18, [#allocation12], %s3767_s26, %s3767_s26, %s3768_s13  }
  0x59   :  { %s3769_s28 = smov [#allocation14]   ;;  %s3770_s2 = smov [#allocation17]  }
  0x5a   :  { %s141_s1 = sshll.u32 %s3769_s28, 4  ;;  %s166_s7 = sshll.u32 %s3770_s2, 4  ;;  %s142_s1 = int_to_ptr.vmem [resolvable:$true] %s141_s1  ;;  %s3961_s7 = int_to_ptr.vmem [resolvable:$true] %s166_s7 }
  0x5b   :  { %s3250_s10 = scalar_lea.hbm %s3833_s29, 512 }
  0x5c   :  { %p3251_p2 = scmp.ne.s32.totalorder %s3833_s29, %s3250_s10  ;;  %p3254_p3 = scmp.lt.u32.totalorder %s3250_s10, %s3833_s29 }
  0x5e   :  { %p3256_p4 = pnand %p3254_p3, %p3251_p2 }
  0x60   :  { %3259 = shalt.err (!%p3256_p4)
}
  0x61   :  { %s3260_s0 = scalar_lea.vmem %s142_s1, 512  ;;  %p3265_p6 = scmp.lt.s32.totalorder %s142_s1, %s142_s1 }
  0x62   :  { %p3261_p5 = scmp.ne.s32.totalorder %s142_s1, %s3260_s0  ;;  %p3266_p7 = scmp.lt.s32.totalorder %s3260_s0, %s3260_s0 }
  0x64   :  { %p3267_p8 = por %p3266_p7, %p3265_p6 }
  0x66   :  { %p3268_p9 = pnand %p3267_p8, %p3261_p5 }
  0x68   :  { %3271 = shalt.err (!%p3268_p9)
}
  0x69   :  { %s3771_s21 = smov 128   ;;  %s3772_s11 = smov 8  }
  0x6a   :  { %147 = dma.hbm_to_vmem [thread:$0]  %s3833_s29, 512, %s142_s1, [#allocation15], %s3771_s21, %s3771_s21, %s3772_s11  }
  0x6b   :  { %s3272_s15 = scalar_lea.hbm %s3843_s8, 16 }
  0x6c   :  { %p3273_p10 = scmp.ne.s32.totalorder %s3843_s8, %s3272_s15  ;;  %p3276_p11 = scmp.lt.u32.totalorder %s3272_s15, %s3843_s8 }
  0x6e   :  { %p3278_p12 = pnand %p3276_p11, %p3273_p10 }
  0x70   :  { %3281 = shalt.err (!%p3278_p12)
}
  0x71   :  { %s3282_s16 = scalar_lea.vmem %s3961_s7, 16  ;;  %s3286_s18 = scalar_lea.vmem %s3961_s7, 32 }
  0x72   :  { %p3283_p13 = scmp.ne.s32.totalorder %s3961_s7, %s3282_s16  ;;  %p3287_p0 = scmp.lt.s32.totalorder %s3961_s7, %s3961_s7 }
  0x73   :  { %p3288_p1 = scmp.lt.s32.totalorder %s3286_s18, %s3282_s16 }
  0x75   :  { %p3289_p2 = por %p3288_p1, %p3287_p0 }
  0x77   :  { %p3290_p3 = pnand %p3289_p2, %p3283_p13 }
  0x79   :  { %3293 = shalt.err (!%p3290_p3)
}
  0x7a   :  { %169 = dma.hbm_to_vmem [thread:$0]  %s3843_s8, 16, %s3961_s7, [#allocation18]  }
  0x7b   :  { %s3773_s29 = smov [#allocation20]   ;;  %s3774_s23 = smov [#allocation23]  }
  0x7c   :  { %s187_s22 = sshll.u32 %s3773_s29, 4  ;;  %s211_s28 = sshll.u32 %s3774_s23, 4  ;;  %s188_s22 = int_to_ptr.vmem [resolvable:$true] %s187_s22  ;;  %s3980_s28 = int_to_ptr.vmem [resolvable:$true] %s211_s28 }
  0x7d   :  { %s3294_s1 = scalar_lea.hbm %s3853_s19, 512 }
  0x7e   :  { %p3295_p4 = scmp.ne.s32.totalorder %s3853_s19, %s3294_s1  ;;  %p3298_p5 = scmp.lt.u32.totalorder %s3294_s1, %s3853_s19 }
  0x80   :  { %p3300_p6 = pnand %p3298_p5, %p3295_p4 }
  0x82   :  { %3303 = shalt.err (!%p3300_p6)
}
  0x83   :  { %s3304_s2 = scalar_lea.vmem %s188_s22, 512  ;;  %p3309_p8 = scmp.lt.s32.totalorder %s188_s22, %s188_s22 }
  0x84   :  { %p3305_p7 = scmp.ne.s32.totalorder %s188_s22, %s3304_s2  ;;  %p3310_p9 = scmp.lt.s32.totalorder %s3304_s2, %s3304_s2 }
  0x86   :  { %p3311_p10 = por %p3310_p9, %p3309_p8 }
  0x88   :  { %p3312_p11 = pnand %p3311_p10, %p3305_p7 }
  0x8a   :  { %3315 = shalt.err (!%p3312_p11)
}
  0x8b   :  { %193 = dma.hbm_to_vmem [thread:$0]  %s3853_s19, 512, %s188_s22, [#allocation21], %s3767_s26, %s3767_s26, %s3768_s13  }
  0x8c   :  { %s3316_s8 = scalar_lea.hbm %s3863_s30, 256 }
  0x8d   :  { %p3317_p12 = scmp.ne.s32.totalorder %s3863_s30, %s3316_s8  ;;  %p3320_p13 = scmp.lt.u32.totalorder %s3316_s8, %s3863_s30 }
  0x8f   :  { %p3322_p0 = pnand %p3320_p13, %p3317_p12 }
  0x91   :  { %3325 = shalt.err (!%p3322_p0)
}
  0x92   :  { %s3326_s7 = scalar_lea.vmem %s3980_s28, 256  ;;  %p3331_p2 = scmp.lt.s32.totalorder %s3980_s28, %s3980_s28 }
  0x93   :  { %p3327_p1 = scmp.ne.s32.totalorder %s3980_s28, %s3326_s7  ;;  %p3332_p3 = scmp.lt.s32.totalorder %s3326_s7, %s3326_s7 }
  0x95   :  { %p3333_p4 = por %p3332_p3, %p3331_p2 }
  0x97   :  { %p3334_p5 = pnand %p3333_p4, %p3327_p1 }
  0x99   :  { %3337 = shalt.err (!%p3334_p5)
}
  0x9a   :  { %217 = dma.hbm_to_vmem [thread:$0]  %s3863_s30, 256, %s3980_s28, [#allocation24], %s3771_s21, %s3771_s21, %s3772_s11  }
  0x9b   :  { %s3775_s19 = smov [#allocation26]   ;;  %s3776_s0 = smov [#allocation29]  }
  0x9c   :  { %s236_s10 = sshll.u32 %s3775_s19, 4  ;;  %s257_s15 = sshll.u32 %s3776_s0, 4  ;;  %s237_s10 = int_to_ptr.vmem [resolvable:$true] %s236_s10  ;;  %s4001_s15 = int_to_ptr.vmem [resolvable:$true] %s257_s15 }
  0x9d   :  { %s3338_s16 = scalar_lea.hbm %s3873_s12, 16 }
  0x9e   :  { %p3339_p6 = scmp.ne.s32.totalorder %s3873_s12, %s3338_s16  ;;  %p3342_p7 = scmp.lt.u32.totalorder %s3338_s16, %s3873_s12 }
  0xa0   :  { %p3344_p8 = pnand %p3342_p7, %p3339_p6 }
  0xa2   :  { %3347 = shalt.err (!%p3344_p8)
}
  0xa3   :  { %s3348_s18 = scalar_lea.vmem %s237_s10, 16  ;;  %s3352_s29 = scalar_lea.vmem %s237_s10, 32 }
  0xa4   :  { %p3349_p9 = scmp.ne.s32.totalorder %s237_s10, %s3348_s18  ;;  %p3353_p10 = scmp.lt.s32.totalorder %s237_s10, %s237_s10 }
  0xa5   :  { %p3354_p11 = scmp.lt.s32.totalorder %s3352_s29, %s3348_s18 }
  0xa7   :  { %p3355_p12 = por %p3354_p11, %p3353_p10 }
  0xa9   :  { %p3356_p13 = pnand %p3355_p12, %p3349_p9 }
  0xab   :  { %3359 = shalt.err (!%p3356_p13)
}
  0xac   :  { %239 = dma.hbm_to_vmem [thread:$0]  %s3873_s12, 16, %s237_s10, [#allocation27]  }
  0xad   :  { %s3360_s30 = scalar_lea.hbm %s3883_s27, 512 }
  0xae   :  { %p3361_p0 = scmp.ne.s32.totalorder %s3883_s27, %s3360_s30  ;;  %p3364_p1 = scmp.lt.u32.totalorder %s3360_s30, %s3883_s27 }
  0xb0   :  { %p3366_p2 = pnand %p3364_p1, %p3361_p0 }
  0xb2   :  { %3369 = shalt.err (!%p3366_p2)
}
  0xb3   :  { %s3370_s22 = scalar_lea.vmem %s4001_s15, 512  ;;  %p3375_p4 = scmp.lt.s32.totalorder %s4001_s15, %s4001_s15 }
  0xb4   :  { %p3371_p3 = scmp.ne.s32.totalorder %s4001_s15, %s3370_s22  ;;  %p3376_p5 = scmp.lt.s32.totalorder %s3370_s22, %s3370_s22 }
  0xb6   :  { %p3377_p6 = por %p3376_p5, %p3375_p4 }
  0xb8   :  { %p3378_p7 = pnand %p3377_p6, %p3371_p3 }
  0xba   :  { %3381 = shalt.err (!%p3378_p7)
}
  0xbb   :  { %263 = dma.hbm_to_vmem [thread:$0]  %s3883_s27, 512, %s4001_s15, [#allocation30], %s3767_s26, %s3767_s26, %s3768_s13  }
  0xbc   :  { %s3777_s12 = smov [#allocation32]   ;;  %s3778_s28 = smov [#allocation35]  }
  0xbd   :  { %s280_s23 = sshll.u32 %s3777_s12, 4  ;;  %s303_s1 = sshll.u32 %s3778_s28, 4  ;;  %s281_s23 = int_to_ptr.vmem [resolvable:$true] %s280_s23  ;;  %s4019_s1 = int_to_ptr.vmem [resolvable:$true] %s303_s1 }
  0xbe   :  { %s3382_s2 = scalar_lea.hbm %s3893_s9, 128 }
  0xbf   :  { %p3383_p8 = scmp.ne.s32.totalorder %s3893_s9, %s3382_s2  ;;  %p3386_p9 = scmp.lt.u32.totalorder %s3382_s2, %s3893_s9 }
  0xc1   :  { %p3388_p10 = pnand %p3386_p9, %p3383_p8 }
  0xc3   :  { %3391 = shalt.err (!%p3388_p10)
}
  0xc4   :  { %s3392_s8 = scalar_lea.vmem %s281_s23, 128  ;;  %p3397_p12 = scmp.lt.s32.totalorder %s281_s23, %s281_s23 }
  0xc5   :  { %p3393_p11 = scmp.ne.s32.totalorder %s281_s23, %s3392_s8  ;;  %p3398_p13 = scmp.lt.s32.totalorder %s3392_s8, %s3392_s8 }
  0xc7   :  { %p3399_p0 = por %p3398_p13, %p3397_p12 }
  0xc9   :  { %p3400_p1 = pnand %p3399_p0, %p3393_p11 }
  0xcb   :  { %3403 = shalt.err (!%p3400_p1)
}
  0xcc   :  { %283 = dma.hbm_to_vmem [thread:$0]  %s3893_s9, 128, %s281_s23, [#allocation33]  }
  0xcd   :  { %s3404_s27 = scalar_lea.hbm %s3908_s4, 512 }
  0xce   :  { %p3405_p2 = scmp.ne.s32.totalorder %s3908_s4, %s3404_s27  ;;  %p3408_p3 = scmp.lt.u32.totalorder %s3404_s27, %s3908_s4 }
  0xd0   :  { %p3410_p4 = pnand %p3408_p3, %p3405_p2 }
  0xd2   :  { %3413 = shalt.err (!%p3410_p4)
}
  0xd3   :  { %s3414_s7 = scalar_lea.vmem %s4019_s1, 512  ;;  %p3419_p6 = scmp.lt.s32.totalorder %s4019_s1, %s4019_s1 }
  0xd4   :  { %p3415_p5 = scmp.ne.s32.totalorder %s4019_s1, %s3414_s7  ;;  %p3420_p7 = scmp.lt.s32.totalorder %s3414_s7, %s3414_s7 }
  0xd6   :  { %p3421_p8 = por %p3420_p7, %p3419_p6 }
  0xd8   :  { %p3422_p9 = pnand %p3421_p8, %p3415_p5 }
  0xda   :  { %3425 = shalt.err (!%p3422_p9)
}
  0xdb   :  { %309 = dma.hbm_to_vmem [thread:$0]  %s3908_s4, 512, %s4019_s1, [#allocation36], %s3767_s26, %s3767_s26, %s3768_s13  }
  0xdc   :  { %s3779_s9 = smov [#allocation38]   ;;  %s3780_s10 = smov [#allocation6]  }
  0xdd   :  { %s328_s19 = sshll.u32 %s3779_s9, 4  ;;  %s81_s0 = sshll.u32 %s3780_s10, 4  ;;  %s329_s19 = int_to_ptr.vmem [resolvable:$true] %s328_s19  ;;  %s4037_s0 = int_to_ptr.vmem [resolvable:$true] %s81_s0 }
  0xde   :  { %s3426_s15 = scalar_lea.hbm %s3918_s20, 64 }
  0xdf   :  { %p3427_p10 = scmp.ne.s32.totalorder %s3918_s20, %s3426_s15  ;;  %p3430_p11 = scmp.lt.u32.totalorder %s3426_s15, %s3918_s20 }
  0xe1   :  { %p3432_p12 = pnand %p3430_p11, %p3427_p10 }
  0xe3   :  { %3435 = shalt.err (!%p3432_p12)
}
  0xe4   :  { %s3436_s16 = scalar_lea.vmem %s329_s19, 64  ;;  %p3441_p0 = scmp.lt.s32.totalorder %s329_s19, %s329_s19 }
  0xe5   :  { %p3437_p13 = scmp.ne.s32.totalorder %s329_s19, %s3436_s16  ;;  %p3442_p1 = scmp.lt.s32.totalorder %s3436_s16, %s3436_s16 }
  0xe7   :  { %p3443_p2 = por %p3442_p1, %p3441_p0 }
  0xe9   :  { %p3444_p3 = pnand %p3443_p2, %p3437_p13 }
  0xeb   :  { %3447 = shalt.err (!%p3444_p3)
}
  0xec   :  { %331 = dma.hbm_to_vmem [thread:$0]  %s3918_s20, 64, %s329_s19, [#allocation39]  }
  0xed   :  { %s3448_s4 = scalar_lea.hbm %s3803_s5, 512 }
  0xee   :  { %p3449_p4 = scmp.ne.s32.totalorder %s3803_s5, %s3448_s4  ;;  %p3452_p5 = scmp.lt.u32.totalorder %s3448_s4, %s3803_s5 }
  0xf0   :  { %p3454_p6 = pnand %p3452_p5, %p3449_p4 }
  0xf2   :  { %3457 = shalt.err (!%p3454_p6)
}
  0xf3   :  { %s3458_s18 = scalar_lea.vmem %s4037_s0, 512  ;;  %p3463_p8 = scmp.lt.s32.totalorder %s4037_s0, %s4037_s0 }
  0xf4   :  { %p3459_p7 = scmp.ne.s32.totalorder %s4037_s0, %s3458_s18  ;;  %p3464_p9 = scmp.lt.s32.totalorder %s3458_s18, %s3458_s18 }
  0xf6   :  { %p3465_p10 = por %p3464_p9, %p3463_p8 }
  0xf8   :  { %p3466_p11 = pnand %p3465_p10, %p3459_p7 }
  0xfa   :  { %3469 = shalt.err (!%p3466_p11)
}
  0xfb   :  { %87 = dma.hbm_to_vmem [thread:$0]  %s3803_s5, 512, %s4037_s0, [#allocation7], %s3771_s21, %s3771_s21, %s3772_s11  }
  0xfc   :  { %s3781_s20 = smov [#allocation10]   ;;  %s3782_s30 = smov [#allocation13]  }
  0xfd   :  { %s105_s29 = sshll.u32 %s3781_s20, 4  ;;  %s129_s22 = sshll.u32 %s3782_s30, 4  ;;  %s106_s29 = int_to_ptr.vmem [resolvable:$true] %s105_s29  ;;  %s4055_s22 = int_to_ptr.vmem [resolvable:$true] %s129_s22 }
  0xfe   :  { %s3470_s12 = scalar_lea.hbm %s3818_s17, 512 }
  0xff   :  { %p3471_p12 = scmp.ne.s32.totalorder %s3818_s17, %s3470_s12  ;;  %p3474_p13 = scmp.lt.u32.totalorder %s3470_s12, %s3818_s17 }
 0x101   :  { %p3476_p0 = pnand %p3474_p13, %p3471_p12 }
 0x103   :  { %3479 = shalt.err (!%p3476_p0)
}
 0x104   :  { %s3480_s23 = scalar_lea.vmem %s106_s29, 512  ;;  %p3485_p2 = scmp.lt.s32.totalorder %s106_s29, %s106_s29 }
 0x105   :  { %p3481_p1 = scmp.ne.s32.totalorder %s106_s29, %s3480_s23  ;;  %p3486_p3 = scmp.lt.s32.totalorder %s3480_s23, %s3480_s23 }
 0x107   :  { %p3487_p4 = por %p3486_p3, %p3485_p2 }
 0x109   :  { %p3488_p5 = pnand %p3487_p4, %p3481_p1 }
 0x10b   :  { %3491 = shalt.err (!%p3488_p5)
}
 0x10c   :  { %111 = dma.hbm_to_vmem [thread:$0]  %s3818_s17, 512, %s106_s29, [#allocation9], %s3767_s26, %s3767_s26, %s3768_s13  }
 0x10d   :  { %s3492_s5 = scalar_lea.hbm %s3828_s25, 512 }
 0x10e   :  { %p3493_p6 = scmp.ne.s32.totalorder %s3828_s25, %s3492_s5  ;;  %p3496_p7 = scmp.lt.u32.totalorder %s3492_s5, %s3828_s25 }
 0x110   :  { %p3498_p8 = pnand %p3496_p7, %p3493_p6 }
 0x112   :  { %3501 = shalt.err (!%p3498_p8)
}
 0x113   :  { %s3502_s28 = scalar_lea.vmem %s4055_s22, 512  ;;  %p3507_p10 = scmp.lt.s32.totalorder %s4055_s22, %s4055_s22 }
 0x114   :  { %p3503_p9 = scmp.ne.s32.totalorder %s4055_s22, %s3502_s28  ;;  %p3508_p11 = scmp.lt.s32.totalorder %s3502_s28, %s3502_s28 }
 0x116   :  { %p3509_p12 = por %p3508_p11, %p3507_p10 }
 0x118   :  { %p3510_p13 = pnand %p3509_p12, %p3503_p9 }
 0x11a   :  { %3513 = shalt.err (!%p3510_p13)
}
 0x11b   :  { %s4360_s17 = sld [smem:[#allocation54_spill]]  ;;  %s3783_s1 = smov [#allocation16]  }
 0x11c   :  { %135 = dma.hbm_to_vmem [thread:$0]  %s3828_s25, 512, %s4055_s22, [#allocation12], %s3771_s21, %s3771_s21, %s3772_s11  }
 0x11d   :  { %s153_s2 = sshll.u32 %s3783_s1, 4  ;;  %s3784_s8 = smov [#allocation19]   ;;  %s154_s2 = int_to_ptr.vmem [resolvable:$true] %s153_s2 }
 0x11e   :  { %s175_s27 = sshll.u32 %s3784_s8, 4  ;;  %s4076_s27 = int_to_ptr.vmem [resolvable:$true] %s175_s27 }
 0x121   :  { %s3514_s7 = scalar_lea.hbm %s4360_s17, 768 }
 0x122   :  { %p3515_p0 = scmp.ne.s32.totalorder %s4360_s17, %s3514_s7  ;;  %p3518_p1 = scmp.lt.u32.totalorder %s3514_s7, %s4360_s17 }
 0x124   :  { %p3520_p2 = pnand %p3518_p1, %p3515_p0 }
 0x126   :  { %3523 = shalt.err (!%p3520_p2)
}
 0x127   :  { %s3524_s9 = scalar_lea.vmem %s154_s2, 768  ;;  %p3529_p4 = scmp.lt.s32.totalorder %s154_s2, %s154_s2 }
 0x128   :  { %p3525_p3 = scmp.ne.s32.totalorder %s154_s2, %s3524_s9  ;;  %p3530_p5 = scmp.lt.s32.totalorder %s3524_s9, %s3524_s9 }
 0x12a   :  { %p3531_p6 = por %p3530_p5, %p3529_p4 }
 0x12c   :  { %p3532_p7 = pnand %p3531_p6, %p3525_p3 }
 0x12e   :  { %3535 = shalt.err (!%p3532_p7)
}
 0x12f   :  { %s4361_s25 = sld [smem:[#allocation55_spill]] }
 0x130   :  { %159 = dma.hbm_to_vmem [thread:$0]  %s4360_s17, 768, %s154_s2, [#allocation15], %s3767_s26, %s3767_s26, %s3768_s13  }
 0x135   :  { %s3536_s19 = scalar_lea.hbm %s4361_s25, 512 }
 0x136   :  { %p3537_p8 = scmp.ne.s32.totalorder %s4361_s25, %s3536_s19  ;;  %p3540_p9 = scmp.lt.u32.totalorder %s3536_s19, %s4361_s25 }
 0x138   :  { %p3542_p10 = pnand %p3540_p9, %p3537_p8 }
 0x13a   :  { %3545 = shalt.err (!%p3542_p10)
}
 0x13b   :  { %s3546_s10 = scalar_lea.vmem %s4076_s27, 512  ;;  %p3551_p12 = scmp.lt.s32.totalorder %s4076_s27, %s4076_s27 }
 0x13c   :  { %p3547_p11 = scmp.ne.s32.totalorder %s4076_s27, %s3546_s10  ;;  %p3552_p13 = scmp.lt.s32.totalorder %s3546_s10, %s3546_s10 }
 0x13e   :  { %p3553_p0 = por %p3552_p13, %p3551_p12 }
 0x140   :  { %p3554_p1 = pnand %p3553_p0, %p3547_p11 }
 0x142   :  { %3557 = shalt.err (!%p3554_p1)
}
 0x143   :  { %s4362_s0 = sld [smem:[#allocation56_spill]]  ;;  %s3785_s15 = smov [#allocation22]  }
 0x144   :  { %181 = dma.hbm_to_vmem [thread:$0]  %s4361_s25, 512, %s4076_s27, [#allocation18], %s3767_s26, %s3767_s26, %s3768_s13  }
 0x145   :  { %s199_s16 = sshll.u32 %s3785_s15, 4  ;;  %s3786_s4 = smov [#allocation25]   ;;  %s200_s16 = int_to_ptr.vmem [resolvable:$true] %s199_s16 }
 0x146   :  { %s223_s18 = sshll.u32 %s3786_s4, 4  ;;  %s4097_s18 = int_to_ptr.vmem [resolvable:$true] %s223_s18 }
 0x149   :  { %s3558_s20 = scalar_lea.hbm %s4362_s0, 256 }
 0x14a   :  { %p3559_p2 = scmp.ne.s32.totalorder %s4362_s0, %s3558_s20  ;;  %p3562_p3 = scmp.lt.u32.totalorder %s3558_s20, %s4362_s0 }
 0x14c   :  { %p3564_p4 = pnand %p3562_p3, %p3559_p2 }
 0x14e   :  { %3567 = shalt.err (!%p3564_p4)
}
 0x14f   :  { %s3568_s29 = scalar_lea.vmem %s200_s16, 256  ;;  %p3573_p6 = scmp.lt.s32.totalorder %s200_s16, %s200_s16 }
 0x150   :  { %p3569_p5 = scmp.ne.s32.totalorder %s200_s16, %s3568_s29  ;;  %p3574_p7 = scmp.lt.s32.totalorder %s3568_s29, %s3568_s29 }
 0x152   :  { %p3575_p8 = por %p3574_p7, %p3573_p6 }
 0x154   :  { %p3576_p9 = pnand %p3575_p8, %p3569_p5 }
 0x156   :  { %3579 = shalt.err (!%p3576_p9)
}
 0x157   :  { %s4363_s30 = sld [smem:[#allocation57_spill]] }
 0x158   :  { %205 = dma.hbm_to_vmem [thread:$0]  %s4362_s0, 256, %s200_s16, [#allocation21], %s3771_s21, %s3771_s21, %s3772_s11  }
 0x15d   :  { %s3580_s22 = scalar_lea.hbm %s4363_s30, 768 }
 0x15e   :  { %p3581_p10 = scmp.ne.s32.totalorder %s4363_s30, %s3580_s22  ;;  %p3584_p11 = scmp.lt.u32.totalorder %s3580_s22, %s4363_s30 }
 0x160   :  { %p3586_p12 = pnand %p3584_p11, %p3581_p10 }
 0x162   :  { %3589 = shalt.err (!%p3586_p12)
}
 0x163   :  { %s3590_s12 = scalar_lea.vmem %s4097_s18, 768  ;;  %p3595_p0 = scmp.lt.s32.totalorder %s4097_s18, %s4097_s18 }
 0x164   :  { %p3591_p13 = scmp.ne.s32.totalorder %s4097_s18, %s3590_s12  ;;  %p3596_p1 = scmp.lt.s32.totalorder %s3590_s12, %s3590_s12 }
 0x166   :  { %p3597_p2 = por %p3596_p1, %p3595_p0 }
 0x168   :  { %p3598_p3 = pnand %p3597_p2, %p3591_p13 }
 0x16a   :  { %3601 = shalt.err (!%p3598_p3)
}
 0x16b   :  { %s4364_s21 = sld [smem:[#allocation58_spill]]  ;;  %s3787_s11 = smov [#allocation28]  }
 0x16c   :  { %229 = dma.hbm_to_vmem [thread:$0]  %s4363_s30, 768, %s4097_s18, [#allocation24], %s3767_s26, %s3767_s26, %s3768_s13  }
 0x16d   :  { %s245_s23 = sshll.u32 %s3787_s11, 4  ;;  %s3788_s5 = smov [#allocation31]   ;;  %s246_s23 = int_to_ptr.vmem [resolvable:$true] %s245_s23 }
 0x16e   :  { %s270_s28 = sshll.u32 %s3788_s5, 4  ;;  %s271_s28 = int_to_ptr.vmem [resolvable:$true] %s270_s28 }
 0x171   :  { %s3602_s17 = scalar_lea.hbm %s4364_s21, 512 }
 0x172   :  { %p3603_p4 = scmp.ne.s32.totalorder %s4364_s21, %s3602_s17  ;;  %p3606_p5 = scmp.lt.u32.totalorder %s3602_s17, %s4364_s21 }
 0x174   :  { %p3608_p6 = pnand %p3606_p5, %p3603_p4 }
 0x176   :  { %3611 = shalt.err (!%p3608_p6)
}
 0x177   :  { %s3612_s1 = scalar_lea.vmem %s246_s23, 512  ;;  %p3617_p8 = scmp.lt.s32.totalorder %s246_s23, %s246_s23 }
 0x178   :  { %p3613_p7 = scmp.ne.s32.totalorder %s246_s23, %s3612_s1  ;;  %p3618_p9 = scmp.lt.s32.totalorder %s3612_s1, %s3612_s1 }
 0x17a   :  { %p3619_p10 = por %p3618_p9, %p3617_p8 }
 0x17c   :  { %p3620_p11 = pnand %p3619_p10, %p3613_p7 }
 0x17e   :  { %3623 = shalt.err (!%p3620_p11)
}
 0x17f   :  { %s4365_s2 = sld [smem:[#allocation59_spill]] }
 0x180   :  { %251 = dma.hbm_to_vmem [thread:$0]  %s4364_s21, 512, %s246_s23, [#allocation27], %s3767_s26, %s3767_s26, %s3768_s13  }
 0x185   :  { %s3624_s8 = scalar_lea.hbm %s4365_s2, 128 }
 0x186   :  { %p3625_p12 = scmp.ne.s32.totalorder %s4365_s2, %s3624_s8  ;;  %p3628_p13 = scmp.lt.u32.totalorder %s3624_s8, %s4365_s2 }
 0x188   :  { %p3630_p0 = pnand %p3628_p13, %p3625_p12 }
 0x18a   :  { %3633 = shalt.err (!%p3630_p0)
}
 0x18b   :  { %s3634_s27 = scalar_lea.vmem %s271_s28, 128  ;;  %p3639_p2 = scmp.lt.s32.totalorder %s271_s28, %s271_s28 }
 0x18c   :  { %p3635_p1 = scmp.ne.s32.totalorder %s271_s28, %s3634_s27  ;;  %p3640_p3 = scmp.lt.s32.totalorder %s3634_s27, %s3634_s27 }
 0x18e   :  { %p3641_p4 = por %p3640_p3, %p3639_p2 }
 0x190   :  { %p3642_p5 = pnand %p3641_p4, %p3635_p1 }
 0x192   :  { %3645 = shalt.err (!%p3642_p5)
}
 0x193   :  { %s4366_s7 = sld [smem:[#allocation60_spill]]  ;;  %s3789_s9 = smov [#allocation34]  }
 0x194   :  { %273 = dma.hbm_to_vmem [thread:$0]  %s4365_s2, 128, %s271_s28, [#allocation30]  }
 0x195   :  { %s289_s25 = sshll.u32 %s3789_s9, 4  ;;  %s3790_s19 = smov [#allocation37]   ;;  %s290_s25 = int_to_ptr.vmem [resolvable:$true] %s289_s25 }
 0x196   :  { %s315_s10 = sshll.u32 %s3790_s19, 4  ;;  %s4129_s10 = int_to_ptr.vmem [resolvable:$true] %s315_s10 }
 0x199   :  { %s3646_s0 = scalar_lea.hbm %s4366_s7, 768 }
 0x19a   :  { %p3647_p6 = scmp.ne.s32.totalorder %s4366_s7, %s3646_s0  ;;  %p3650_p7 = scmp.lt.u32.totalorder %s3646_s0, %s4366_s7 }
 0x19c   :  { %p3652_p8 = pnand %p3650_p7, %p3647_p6 }
 0x19e   :  { %3655 = shalt.err (!%p3652_p8)
}
 0x19f   :  { %s3656_s15 = scalar_lea.vmem %s290_s25, 768  ;;  %p3661_p10 = scmp.lt.s32.totalorder %s290_s25, %s290_s25 }
 0x1a0   :  { %p3657_p9 = scmp.ne.s32.totalorder %s290_s25, %s3656_s15  ;;  %p3662_p11 = scmp.lt.s32.totalorder %s3656_s15, %s3656_s15 }
 0x1a2   :  { %p3663_p12 = por %p3662_p11, %p3661_p10 }
 0x1a4   :  { %p3664_p13 = pnand %p3663_p12, %p3657_p9 }
 0x1a6   :  { %3667 = shalt.err (!%p3664_p13)
}
 0x1a7   :  { %s4367_s16 = sld [smem:[#allocation62_spill]] }
 0x1a8   :  { %295 = dma.hbm_to_vmem [thread:$0]  %s4366_s7, 768, %s290_s25, [#allocation33], %s3767_s26, %s3767_s26, %s3768_s13  }
 0x1ad   :  { %s3668_s4 = scalar_lea.hbm %s4367_s16, 512 }
 0x1ae   :  { %p3669_p0 = scmp.ne.s32.totalorder %s4367_s16, %s3668_s4  ;;  %p3672_p1 = scmp.lt.u32.totalorder %s3668_s4, %s4367_s16 }
 0x1b0   :  { %p3674_p2 = pnand %p3672_p1, %p3669_p0 }
 0x1b2   :  { %3677 = shalt.err (!%p3674_p2)
}
 0x1b3   :  { %s3678_s18 = scalar_lea.vmem %s4129_s10, 512  ;;  %p3683_p4 = scmp.lt.s32.totalorder %s4129_s10, %s4129_s10 }
 0x1b4   :  { %p3679_p3 = scmp.ne.s32.totalorder %s4129_s10, %s3678_s18  ;;  %p3684_p5 = scmp.lt.s32.totalorder %s3678_s18, %s3678_s18 }
 0x1b6   :  { %p3685_p6 = por %p3684_p5, %p3683_p4 }
 0x1b8   :  { %p3686_p7 = pnand %p3685_p6, %p3679_p3 }
 0x1ba   :  { %3689 = shalt.err (!%p3686_p7)
}
 0x1bb   :  { %s4368_s20 = sld [smem:[#allocation63_spill]]  ;;  %s3791_s29 = smov [#allocation40]  }
 0x1bc   :  { %321 = dma.hbm_to_vmem [thread:$0]  %s4367_s16, 512, %s4129_s10, [#allocation36], %s3767_s26, %s3767_s26, %s3768_s13  }
 0x1bd   :  { %s338_s30 = sshll.u32 %s3791_s29, 4  ;;  %s339_s30 = int_to_ptr.vmem [resolvable:$true] %s338_s30 }
 0x1c1   :  { %s3690_s22 = scalar_lea.hbm %s4368_s20, 64 }
 0x1c2   :  { %p3691_p8 = scmp.ne.s32.totalorder %s4368_s20, %s3690_s22  ;;  %p3694_p9 = scmp.lt.u32.totalorder %s3690_s22, %s4368_s20 }
 0x1c4   :  { %p3696_p10 = pnand %p3694_p9, %p3691_p8 }
 0x1c6   :  { %3699 = shalt.err (!%p3696_p10)
}
 0x1c7   :  { %s3700_s12 = scalar_lea.vmem %s339_s30, 64  ;;  %p3705_p12 = scmp.lt.s32.totalorder %s339_s30, %s339_s30 }
 0x1c8   :  { %p3701_p11 = scmp.ne.s32.totalorder %s339_s30, %s3700_s12  ;;  %p3706_p13 = scmp.lt.s32.totalorder %s3700_s12, %s3700_s12 }
 0x1ca   :  { %p3707_p0 = por %p3706_p13, %p3705_p12 }
 0x1cc   :  { %p3708_p1 = pnand %p3707_p0, %p3701_p11 }
 0x1ce   :  { %3711 = shalt.err (!%p3708_p1)
}
 0x1cf   :  { %341 = dma.hbm_to_vmem [thread:$0]  %s4368_s20, 64, %s339_s30, [#allocation39]  }
 0x1d0   :  { %3712 = dma.done.wait [#allocation7], 512  }
 0x1d1   :  { %3713 = vsyncadd [#allocation7], 4294966784 }
 0x1d2   :  { %3714 = dma.done.wait [#allocation9], 528  }
 0x1d3   :  { %3715 = vsyncadd [#allocation9], 4294966768 }
 0x1d4   :  { %3716 = dma.done.wait [#allocation12], 1024  }
 0x1d5   :  { %3717 = vsyncadd [#allocation12], 4294966272 }
 0x1d6   :  { %3718 = dma.done.wait [#allocation15], 1280  }
 0x1d7   :  { %3719 = vsyncadd [#allocation15], 4294966016 }
 0x1d8   :  { %3720 = dma.done.wait [#allocation18], 528  }
 0x1d9   :  { %3721 = vsyncadd [#allocation18], 4294966768 }
 0x1da   :  { %3722 = dma.done.wait [#allocation21], 768  }
 0x1db   :  { %3723 = vsyncadd [#allocation21], 4294966528 }
 0x1dc   :  { %3724 = dma.done.wait [#allocation24], 1024  }
 0x1dd   :  { %3725 = vsyncadd [#allocation24], 4294966272 }
 0x1de   :  { %3726 = dma.done.wait [#allocation27], 528  }
 0x1df   :  { %3727 = vsyncadd [#allocation27], 4294966768 }
 0x1e0   :  { %3728 = dma.done.wait [#allocation30], 640  }
 0x1e1   :  { %3729 = vsyncadd [#allocation30], 4294966656 }
 0x1e2   :  { %3730 = dma.done.wait [#allocation33], 896  }
 0x1e3   :  { %3731 = vsyncadd [#allocation33], 4294966400 }
 0x1e4   :  { %3732 = dma.done.wait [#allocation36], 1024  }
 0x1e5   :  { %3733 = vsyncadd [#allocation36], 4294966272 }
 0x1e6   :  { %3734 = dma.done.wait [#allocation39], 128  }
 0x1e7   :  { %3735 = vsyncadd [#allocation39], 4294967168  ;;  %s4369_s26 = sld [smem:[#allocation53_spill]]  ;;  %v3792_v0 = vmov 0   ;;  %v443_v1 = vld [vmem:[#allocation13 + $0x10] sm:$0xff]  ;;  %v441_v2 = vld [vmem:[#allocation13] sm:$0xff] }
 0x1e8   :  { %3108 = vset.pattern.permute.xlu1 %v3792_v0  ;;  %3107 = vset.pattern.permute.xlu0 %v3792_v0  ;;  %v444_v3 = vld [vmem:[#allocation13 + $0x18] sm:$0xff]  ;;  %v442_v4 = vld [vmem:[#allocation13 + $0x8] sm:$0xff]  ;;  %v482_v6 = vld [vmem:[#allocation14] sm:$0xff]  ;;  %vm428_vm0 = vcmask 1040384   ;;  %vm521_vm1 = vcmask 130048   ;;  %vm469_vm2 = vcmask 1046528  }
 0x1e9   :  { %457 = vperm.xlu1 %3108, %v443_v1   ;;  %447 = vperm.xlu0 %3107, %v441_v2   ;;  %v483_v5 = vld [vmem:[#allocation14 + $0x8] sm:$0xff]  ;;  %v485_v8 = vld [vmem:[#allocation14 + $0x18] sm:$0xff]  ;;  %v484_v9 = vld [vmem:[#allocation14 + $0x10] sm:$0xff]  ;;  %v3793_v63 = vmov 0.0   ;;  %vm3794_vm3 = vmmov 0   ;;  %vm729_vm4 = vcmask 523264  }
 0x1ea   :  { %v904_v11 = vld [vmem:[#allocation22 + $0x8] sm:$0xff]  ;;  %v903_v12 = vld [vmem:[#allocation22] sm:$0xff]  ;;  %v924_v13 = vld [vmem:[#allocation23 + $0x8] sm:$0xff]  ;;  %2840 = vmatprep.subr.bf16.mxu1 %v3793_v63  ;;  %2848 = vmatprep.mubr.msk.bf16.mxu1 %vm3794_vm3, %v3793_v63  ;;  %vm955_vm5 = vcmask 261120   ;;  %vm1670_vm6 = vcmask 1042432   ;;  %s4370_s13 = sld [smem:[#allocation64_spill]] }
 0x1eb   :  { %v923_v14 = vld [vmem:[#allocation23] sm:$0xff]  ;;  %v1305_v15 = vld [vmem:[#allocation32] sm:$0xff]  ;;  %v423_v22 = vld [vmem:[#allocation6 + $0x18] sm:$0xff]  ;;  %s4371_s21 = sld [smem:[#allocation61_spill]]  ;;  %vm1870_vm7 = vcmask 519168  }
 0x1ec   :  { %v1295_v16 = vld [vmem:[#allocation31] sm:$0xff]  ;;  %v422_v20 = vld [vmem:[#allocation6 + $0x10] sm:$0xff]  ;;  %v434_v26 = vrot.slane %v423_v22, 7  ;;  %v475_v54 = vrot.slane %v423_v22, 1 }
 0x1ed   :  { %462 = vperm.xlu1 %3108, %v444_v3   ;;  %452 = vperm.xlu0 %3107, %v442_v4   ;;  %v3109_v7 = vld [vmem:[%s4369_s26] sm:$0xff]   ;;  %v3110_v10 = vld [vmem:[%s4369_s26 + $0x8] sm:$0xff]   ;;  %v432_v24 = vrot.slane %v422_v20, 7  ;;  %v3111_v42 = vld [vmem:[%s4369_s26 + $0x10] sm:$0xff]   ;;  %v473_v44 = vrot.slane %v422_v20, 1  ;;  %v588_v52 = vpack.c.bf16 %v423_v22, %v422_v20 }
 0x1ee   :  { %2822 = vmatprep.subr.bf16.mxu0 %v3109_v7  ;;  %v1672_v17 = vld [vmem:[#allocation40] sm:$0xf]  ;;  %v1661_v18 = vld [vmem:[#allocation38] sm:$0xf]  ;;  %v481_v56 = vsel %vm469_vm2, %v475_v54, 0.0  ;;  %v3114_v2 = vld [vmem:[#allocation10 + $0x10] sm:$0xff]  }
 0x1ef   :  { %2823 = vmatpush3.bf16.msra.mxu0 %v3109_v7  ;;  %v421_v19 = vld [vmem:[#allocation6 + $0x8] sm:$0xff]  ;;  %v420_v21 = vld [vmem:[#allocation6] sm:$0xff]  ;;  %v435_v31 = vsel %vm428_vm0, %v432_v24, %v434_v26  ;;  %v476_v58 = vsel %vm469_vm2, %v473_v44, %v475_v54  ;;  %v3118_v26 = vld [vmem:[#allocation11 + $0x10] sm:$0xff]  }
 0x1f0   :  { %2828 = vmatprep.subr.bf16.mxu0 %v3110_v10  ;;  %v430_v23 = vrot.slane %v421_v19, 7  ;;  %v429_v25 = vrot.slane %v420_v21, 7  ;;  %v587_v41 = vpack.c.bf16 %v421_v19, %v420_v21  ;;  %v471_v43 = vrot.slane %v421_v19, 1  ;;  %v3112_v62 = vld [vmem:[#allocation10] sm:$0xff]   ;;  %v3113_v1 = vld [vmem:[#allocation10 + $0x8] sm:$0xff]   ;;  %v3115_v3 = vld [vmem:[#allocation10 + $0x18] sm:$0xff]  }
 0x1f1   :  { %493 = vperm.xlu1 %3108, %v483_v5   ;;  %488 = vperm.xlu0 %3107, %v482_v6   ;;  %v470_v45 = vrot.slane %v420_v21, 1  ;;  %v2582_v4 = vld [vmem:[#allocation8] ss:$0 sm:$0xff] }
 0x1f2   :  { %v433_v29 = vsel %vm428_vm0, %v430_v23, %v432_v24  ;;  %v440_v30 = vsel %vm428_vm0, 0.0, %v429_v25  ;;  %v431_v32 = vsel %vm428_vm0, %v429_v25, %v430_v23  ;;  %v474_v47 = vsel %vm469_vm2, %v471_v43, %v473_v44  ;;  %2841 = vmatpush3.bf16.msra.mxu1 %v3112_v62  ;;  %v3116_v23 = vld [vmem:[#allocation11] sm:$0xff]   ;;  %v3117_v25 = vld [vmem:[#allocation11 + $0x8] sm:$0xff]  }
 0x1f3   :  { %v472_v49 = vsel %vm469_vm2, %v470_v45, %v471_v43  ;;  %2842 = vmatprep.subr.bf16.mxu1 %v3793_v63  ;;  %v3125_v62 = vld [vmem:[#allocation16 + $0x28] sm:$0xff]  }
 0x1f5   :  { %503 = vperm.xlu1 %3108, %v485_v8   ;;  %498 = vperm.xlu0 %3107, %v484_v9  }
 0x1f6   :  { %2843 = vmatpush3.bf16.msra.mxu1 %v3113_v1  ;;  %v3126_v1 = vld [vmem:[#allocation19] sm:$0xff]  }
 0x1f7   :  { %2844 = vmatprep.subr.bf16.mxu1 %v3793_v63 }
 0x1f9   :  { %912 = vperm.xlu1 %3108, %v904_v11   ;;  %907 = vperm.xlu0 %3107, %v903_v12  }
 0x1fa   :  { %2845 = vmatpush3.bf16.msra.mxu1 %v3114_v2  ;;  %v3127_v2 = vld [vmem:[#allocation20] sm:$0xff]  }
 0x1fb   :  { %2846 = vmatprep.subr.bf16.mxu1 %v3793_v63 }
 0x1fd   :  { %932 = vperm.xlu1 %3108, %v924_v13   ;;  %927 = vperm.xlu0 %3107, %v923_v14  }
 0x1fe   :  { %2847 = vmatpush3.bf16.msra.mxu1 %v3115_v3  ;;  %v3128_v3 = vld [vmem:[#allocation19 + $0x8] sm:$0xff]  }
 0x1ff   :  { %2852 = vmatprep.subr.bf16.mxu1 %v3793_v63 }
 0x201   :  { %1308 = vperm.xlu1 %3108, %v1305_v15   ;;  %1298 = vperm.xlu0 %3107, %v1295_v16  }
 0x205   :  { %1675 = vperm.xlu1 %3108, %v1672_v17   ;;  %1664 = vperm.xlu0 %3107, %v1661_v18  }
 0x268   :  { %v458_v27 = vpop.permute.xlu1 %457  ;;  %v448_v28 = vpop.permute.xlu0 %447 }
 0x269   :  { %v467_v35 = vmul.f32 %v458_v27, %v433_v29  ;;  %v465_v36 = vmul.f32 %v448_v28, %v440_v30  ;;  %v3119_v27 = vld [vmem:[#allocation11 + $0x18] sm:$0xff]   ;;  %v3120_v28 = vld [vmem:[#allocation16] sm:$0xff]   ;;  %v3121_v29 = vld [vmem:[#allocation16 + $0x8] sm:$0xff]  }
 0x26c   :  { %v463_v33 = vpop.permute.xlu1 %462  ;;  %v453_v34 = vpop.permute.xlu0 %452 }
 0x26d   :  { %v468_v37 = vmul.f32 %v463_v33, %v435_v31  ;;  %v466_v38 = vmul.f32 %v453_v34, %v431_v32 }
 0x26f   :  { %v512_v39 = vpack.c.bf16 %v468_v37, %v467_v35  ;;  %v511_v40 = vpack.c.bf16 %v466_v38, %v465_v36 }
 0x270   :  { %v494_v46 = vpop.permute.xlu1 %493  ;;  %v489_v48 = vpop.permute.xlu0 %488 }
 0x271   :  { %2824 = vmatprep.mubr.msk.bf16.mxu0 %vm521_vm1, %v511_v40  ;;  %v507_v50 = vmul.f32 %v494_v46, %v474_v47  ;;  %v506_v51 = vmul.f32 %v489_v48, %v472_v49 }
 0x272   :  { %2825 = vmatmul.mubr.msk.bf16.vlgmr.msra.gmra.mrb[0].mxu0 %vm521_vm1, %v512_v39 }
 0x273   :  { %2829 = vmatpush3.bf16.msra.mxu0 %v3110_v10  ;;  %2830 = vmatprep.mubr.msk.bf16.mxu0 %vm521_vm1, %v587_v41  ;;  %v656_v53 = vpack.c.bf16 %v507_v50, %v506_v51 }
 0x274   :  { %2834 = vmatprep.subr.bf16.mxu0 %v3111_v42  ;;  %v504_v55 = vpop.permute.xlu1 %503  ;;  %v499_v57 = vpop.permute.xlu0 %498 }
 0x275   :  { %v509_v59 = vmul.f32 %v504_v55, %v481_v56  ;;  %v508_v60 = vmul.f32 %v499_v57, %v476_v58  ;;  %v3122_v57 = vld [vmem:[#allocation16 + $0x10] sm:$0xff]  }
 0x277   :  { %v657_v61 = vpack.c.bf16 %v509_v59, %v508_v60  ;;  %v3123_v60 = vld [vmem:[#allocation16 + $0x18] sm:$0xff]  }
 0x278   :  { %v913_v34 = vpop.permute.xlu1 %912  ;;  %v908_v36 = vpop.permute.xlu0 %907 }
 0x27c   :  { %v933_v48 = vpop.permute.xlu1 %932  ;;  %v928_v49 = vpop.permute.xlu0 %927 }
 0x27e   :  { %2831 = vmatmul.mubr.msk.bf16.vlgmr.msra.gmra.mrb[0].mxu0 %vm521_vm1, %v588_v52 }
 0x27f   :  { %2835 = vmatpush3.bf16.msra.mxu0 %v3111_v42  ;;  %2836 = vmatprep.mubr.msk.bf16.mxu0 %vm521_vm1, %v656_v53 }
 0x280   :  { %2864 = vmatprep.subr.bf16.mxu0 %v3793_v63 }
 0x28a   :  { %2837 = vmatmul.mubr.msk.bf16.vlgmr.msra.gmra.mrb[0].mxu0 %vm521_vm1, %v657_v61  ;;  %v3124_v61 = vld [vmem:[#allocation16 + $0x20] sm:$0xff]  }
 0x28b   :  { %2868 = vmatprep.mubr.msk.bf16.mxu0 %vm3794_vm3, %v3793_v63  ;;  %2865 = vmatpush3.bf16.msra.mxu0 %v3120_v28 }
 0x28c   :  { %2866 = vmatprep.subr.bf16.mxu0 %v3793_v63 }
 0x28f   :  { %2867 = vmatpush3.bf16.msra.mxu0 %v3121_v29 }
 0x290   :  { %2872 = vmatprep.subr.bf16.mxu0 %v3793_v63 }
 0x35d   :  { %v2838_v5 = vpop.f32.mrb[0].mxu0 }
 0x35e   :  { %v3008_v6 = vadd.f32 %v2838_v5, %v2582_v4  ;;  %v706_v7 = vpop.f32.mrb[1].mxu0  ;;  %v3130_v5 = vld [vmem:[#allocation19 + $0x10] sm:$0xff]  }
 0x35f   :  { %v3009_v8 = vadd.f32 %v2582_v4, %v706_v7  ;;  %v2839_v9 = vpop.f32.mrb[2].mxu0  ;;  %v3132_v7 = vld [vmem:[#allocation19 + $0x18] sm:$0xff]  }
 0x360   :  { %v727_v10 = vmax.f32 %v3008_v6, 0.0  ;;  %v3010_v11 = vadd.f32 %v2839_v9, %v2582_v4  ;;  %v709_v12 = vpop.f32.mrb[3].mxu0  ;;  %v3131_v6 = vld [vmem:[#allocation20 + $0x10] sm:$0xff]   ;;  %v2602_v9 = vld [vmem:[#allocation17] ss:$0 sm:$0xff] }
 0x361   :  { %v725_v13 = vmax.f32 %v3009_v8, 0.0  ;;  %v3011_v14 = vadd.f32 %v2582_v4, %v709_v12  ;;  %v3129_v4 = vld [vmem:[#allocation20 + $0x8] sm:$0xff]   ;;  %v3133_v8 = vld [vmem:[#allocation20 + $0x18] sm:$0xff]  }
 0x362   :  { %732 = vst.msk [vmem:[#allocation2 + $0x10] sm:$0xff] %vm729_vm4, %v727_v10  ;;  %v728_v15 = vmax.f32 %v3010_v11, 0.0 }
 0x363   :  { %730 = vst.msk [vmem:[#allocation2] sm:$0xff] %vm729_vm4, %v725_v13  ;;  %v726_v16 = vmax.f32 %v3011_v14, 0.0 }
 0x364   :  { %733 = vst.msk [vmem:[#allocation2 + $0x18] sm:$0xff] %vm729_vm4, %v728_v15 }
 0x365   :  { %731 = vst.msk [vmem:[#allocation2 + $0x8] sm:$0xff] %vm729_vm4, %v726_v16 }
 0x36b   :  { %v736_v17 = vld [vmem:[#allocation2 + $0x10] ss:$2 sm:$0xff]  ;;  %v740_v18 = vld [vmem:[#allocation2 + $0x11] ss:$2 sm:$0xff] }
 0x36c   :  { %v734_v19 = vld [vmem:[#allocation2] ss:$2 sm:$0xff]  ;;  %v738_v20 = vld [vmem:[#allocation2 + $0x1] ss:$2 sm:$0xff]  ;;  %v742_v21 = vmax.f32 %v736_v17, %v740_v18 }
 0x36d   :  { %v741_v22 = vmax.f32 %v734_v19, %v738_v20 }
 0x36f   :  { %v743_v24 = vpack.c.bf16 %v742_v21, %v741_v22  ;;  %v3134_v22 = vld [vmem:[#allocation25] sm:$0xff]  }
 0x371   :  { %2849 = vmatmul.mubr.msk.bf16.vlgmr.msra.gmra.mrb[0].mxu1 %vm729_vm4, %v743_v24 }
 0x372   :  { %2853 = vmatpush3.bf16.msra.mxu1 %v3116_v23  ;;  %2860 = vmatprep.mubr.msk.bf16.mxu1 %vm3794_vm3, %v3793_v63  ;;  %v3135_v23 = vld [vmem:[#allocation25 + $0x8] sm:$0xff]  }
 0x373   :  { %2854 = vmatprep.subr.bf16.mxu1 %v3793_v63 }
 0x376   :  { %2855 = vmatpush3.bf16.msra.mxu1 %v3117_v25 }
 0x377   :  { %2856 = vmatprep.subr.bf16.mxu1 %v3793_v63 }
 0x37a   :  { %2857 = vmatpush3.bf16.msra.mxu1 %v3118_v26 }
 0x37b   :  { %2858 = vmatprep.subr.bf16.mxu1 %v3793_v63 }
 0x37e   :  { %2859 = vmatpush3.bf16.msra.mxu1 %v3119_v27 }
 0x37f   :  { %2888 = vmatprep.subr.bf16.mxu1 %v3793_v63 }
 0x381   :  { %2861 = vmatmul.mubr.msk.bf16.vlgmr.msra.gmra.mrb[4].mxu1 %vm729_vm4, %v743_v24 }
 0x382   :  { %2896 = vmatprep.mubr.msk.bf16.mxu1 %vm3794_vm3, %v3793_v63  ;;  %2889 = vmatpush3.bf16.msra.mxu1 %v3126_v1 }
 0x383   :  { %2890 = vmatprep.subr.bf16.mxu1 %v3793_v63 }
 0x386   :  { %2891 = vmatpush3.bf16.msra.mxu1 %v3128_v3 }
 0x387   :  { %2892 = vmatprep.subr.bf16.mxu1 %v3793_v63 }
 0x38a   :  { %2893 = vmatpush3.bf16.msra.mxu1 %v3130_v5  ;;  %v3148_v5 = vld [vmem:[#allocation34] sm:$0xff]  }
 0x38b   :  { %2894 = vmatprep.subr.bf16.mxu1 %v3793_v63 }
 0x38e   :  { %2895 = vmatpush3.bf16.msra.mxu1 %v3132_v7 }
 0x38f   :  { %2912 = vmatprep.subr.bf16.mxu1 %v3793_v63 }
 0x444   :  { %v813_v30 = vpop.f32.mrb[0].mxu1 }
 0x445   :  { %v2850_v31 = vpop.f32.mrb[1].mxu1 }
 0x446   :  { %v816_v32 = vpop.f32.mrb[2].mxu1 }
 0x447   :  { %v2851_v33 = vpop.f32.mrb[3].mxu1 }
 0x454   :  { %v886_v35 = vpop.f32.mrb[4].mxu1 }
 0x455   :  { %v893_v37 = vmax.f32 %v813_v30, %v886_v35  ;;  %v2862_v38 = vpop.f32.mrb[5].mxu1 }
 0x456   :  { %v889_v39 = vpop.f32.mrb[6].mxu1 }
 0x457   :  { %v897_v40 = vrot.slane %v893_v37, 7  ;;  %v894_v41 = vmax.f32 %v816_v32, %v889_v39  ;;  %v2863_v42 = vpop.f32.mrb[7].mxu1  ;;  %v917_v43 = vrot.slane %v893_v37, 1  ;;  %v3137_v39 = vld [vmem:[#allocation25 + $0x18] sm:$0xff]  }
 0x459   :  { %v902_v44 = vsel %vm428_vm0, 0.0, %v897_v40  ;;  %v898_v45 = vrot.slane %v894_v41, 7  ;;  %v918_v46 = vrot.slane %v894_v41, 1  ;;  %v1008_v47 = vpack.c.bf16 %v894_v41, %v893_v37  ;;  %v3136_v37 = vld [vmem:[#allocation25 + $0x10] sm:$0xff]  }
 0x45a   :  { %v915_v53 = vmul.f32 %v908_v36, %v902_v44 }
 0x45b   :  { %v899_v50 = vsel %vm428_vm0, %v897_v40, %v898_v45  ;;  %v919_v51 = vsel %vm469_vm2, %v917_v43, %v918_v46  ;;  %v922_v52 = vsel %vm469_vm2, %v918_v46, 0.0  ;;  %v3138_v40 = vld [vmem:[#allocation25 + $0x20] sm:$0xff]   ;;  %v3139_v43 = vld [vmem:[#allocation25 + $0x28] sm:$0xff]   ;;  %v1309_v45 = vpop.permute.xlu1 %1308 }
 0x45c   :  { %v916_v54 = vmul.f32 %v913_v34, %v899_v50  ;;  %v935_v55 = vmul.f32 %v928_v49, %v919_v51  ;;  %v936_v56 = vmul.f32 %v933_v48, %v922_v52  ;;  %v1299_v34 = vpop.permute.xlu0 %1298  ;;  %v3140_v48 = vld [vmem:[#allocation28] sm:$0xff]   ;;  %v3142_v50 = vld [vmem:[#allocation28 + $0x8] sm:$0xff]   ;;  %v3144_v52 = vld [vmem:[#allocation28 + $0x10] sm:$0xff]  }
 0x45d   :  { %v3141_v49 = vld [vmem:[#allocation29] sm:$0xff]   ;;  %v3143_v51 = vld [vmem:[#allocation29 + $0x8] sm:$0xff]  }
 0x45e   :  { %v1071_v58 = vpack.c.bf16 %v936_v56, %v935_v55  ;;  %v938_v59 = vpack.c.bf16 %v916_v54, %v915_v53  ;;  %v3145_v53 = vld [vmem:[#allocation29 + $0x10] sm:$0xff]   ;;  %v3146_v54 = vld [vmem:[#allocation28 + $0x18] sm:$0xff]  }
 0x45f   :  { %v3147_v55 = vld [vmem:[#allocation29 + $0x18] sm:$0xff]  }
 0x460   :  { %2869 = vmatmul.mubr.msk.bf16.vlgmr.msra.gmra.mrb[4].mxu0 %vm955_vm5, %v938_v59  ;;  %v2622_v56 = vld [vmem:[#allocation26] ss:$0 sm:$0xff] }
 0x461   :  { %2873 = vmatpush3.bf16.msra.mxu0 %v3122_v57  ;;  %2876 = vmatprep.mubr.msk.bf16.mxu0 %vm3794_vm3, %v3793_v63 }
 0x462   :  { %2874 = vmatprep.subr.bf16.mxu0 %v3793_v63 }
 0x465   :  { %2875 = vmatpush3.bf16.msra.mxu0 %v3123_v60 }
 0x466   :  { %2880 = vmatprep.subr.bf16.mxu0 %v3793_v63 }
 0x46c   :  { %2877 = vmatmul.mubr.msk.bf16.vlgmr.msra.gmra.mrb[4].mxu0 %vm955_vm5, %v1008_v47 }
 0x46d   :  { %2881 = vmatpush3.bf16.msra.mxu0 %v3124_v61  ;;  %2884 = vmatprep.mubr.msk.bf16.mxu0 %vm3794_vm3, %v3793_v63 }
 0x46e   :  { %2882 = vmatprep.subr.bf16.mxu0 %v3793_v63 }
 0x471   :  { %2883 = vmatpush3.bf16.msra.mxu0 %v3125_v62 }
 0x472   :  { %2900 = vmatprep.subr.bf16.mxu0 %v3793_v63 }
 0x478   :  { %2885 = vmatmul.mubr.msk.bf16.vlgmr.msra.gmra.mrb[4].mxu0 %vm955_vm5, %v1071_v58 }
 0x479   :  { %2908 = vmatprep.mubr.msk.bf16.mxu0 %vm3794_vm3, %v3793_v63  ;;  %2901 = vmatpush3.bf16.msra.mxu0 %v3127_v2 }
 0x47a   :  { %2902 = vmatprep.subr.bf16.mxu0 %v3793_v63 }
 0x47d   :  { %2903 = vmatpush3.bf16.msra.mxu0 %v3129_v4 }
 0x47e   :  { %2904 = vmatprep.subr.bf16.mxu0 %v3793_v63 }
 0x481   :  { %2905 = vmatpush3.bf16.msra.mxu0 %v3131_v6  ;;  %v3149_v6 = vld [vmem:[#allocation34 + $0x8] sm:$0xff]  }
 0x482   :  { %2906 = vmatprep.subr.bf16.mxu0 %v3793_v63 }
 0x485   :  { %2907 = vmatpush3.bf16.msra.mxu0 %v3133_v8 }
 0x486   :  { %2936 = vmatprep.subr.bf16.mxu0 %v3793_v63 }
 0x54b   :  { %v1125_v10 = vpop.f32.mrb[4].mxu0 }
 0x54c   :  { %v3012_v11 = vadd.f32 %v2602_v9, %v1125_v10  ;;  %v2886_v12 = vpop.f32.mrb[5].mxu0 }
 0x54d   :  { %v1128_v13 = vpop.f32.mrb[6].mxu0 }
 0x54e   :  { %v1134_v14 = vmax.f32 %v3012_v11, 0.0  ;;  %v3013_v15 = vadd.f32 %v2602_v9, %v1128_v13  ;;  %v2887_v16 = vpop.f32.mrb[7].mxu0 }
 0x550   :  { %1136 = vst.msk [vmem:[#allocation3] sm:$0xff] %vm729_vm4, %v1134_v14  ;;  %v1135_v17 = vmax.f32 %v3013_v15, 0.0 }
 0x552   :  { %1137 = vst.msk [vmem:[#allocation3 + $0x8] sm:$0xff] %vm729_vm4, %v1135_v17  ;;  %v1665_v17 = vpop.permute.xlu0 %1664 }
 0x559   :  { %v1138_v18 = vld [vmem:[#allocation3] ss:$2 sm:$0xff]  ;;  %v1140_v19 = vld [vmem:[#allocation3 + $0x1] ss:$2 sm:$0xff] }
 0x55a   :  { %v1141_v20 = vmax.f32 %v1138_v18, %v1140_v19 }
 0x55c   :  { %v1142_v21 = vpack.c.bf16 %v1141_v20, %v1141_v20  ;;  %v3150_v20 = vld [vmem:[#allocation34 + $0x10] sm:$0xff]  }
 0x55e   :  { %2897 = vmatmul.mubr.msk.bf16.vlgmr.msra.gmra.mrb[8].mxu1 %vm729_vm4, %v1142_v21  ;;  %2909 = vmatmul.mubr.msk.bf16.vlgmr.msra.gmra.mrb[8].mxu0 %vm729_vm4, %v1142_v21 }
 0x55f   :  { %2916 = vmatprep.mubr.msk.bf16.mxu1 %vm3794_vm3, %v3793_v63  ;;  %2944 = vmatprep.mubr.msk.bf16.mxu0 %vm3794_vm3, %v3793_v63 }
 0x560   :  { %2913 = vmatpush3.bf16.msra.mxu1 %v3134_v22  ;;  %2937 = vmatpush3.bf16.msra.mxu0 %v3140_v48  ;;  %v3151_v22 = vld [vmem:[#allocation34 + $0x18] sm:$0xff]  }
 0x561   :  { %2914 = vmatprep.subr.bf16.mxu1 %v3793_v63  ;;  %2938 = vmatprep.subr.bf16.mxu0 %v3793_v63 }
 0x564   :  { %2915 = vmatpush3.bf16.msra.mxu1 %v3135_v23  ;;  %2939 = vmatpush3.bf16.msra.mxu0 %v3142_v50  ;;  %v3152_v23 = vld [vmem:[#allocation34 + $0x20] sm:$0xff]  }
 0x565   :  { %2920 = vmatprep.subr.bf16.mxu1 %v3793_v63  ;;  %2940 = vmatprep.subr.bf16.mxu0 %v3793_v63 }
 0x568   :  { %2941 = vmatpush3.bf16.msra.mxu0 %v3144_v52  ;;  %v3165_v52 = vld [vmem:[%s4370_s13 + $0x20] ss:$16 sps:$4 sm:$0xff]  }
 0x569   :  { %2942 = vmatprep.subr.bf16.mxu0 %v3793_v63 }
 0x56c   :  { %2943 = vmatpush3.bf16.msra.mxu0 %v3146_v54  ;;  %v3174_v54 = vld [vmem:[%s3938_s3 + $0x40] sm:$0xff]  }
 0x56d   :  { %2960 = vmatprep.subr.bf16.mxu0 %v3793_v63 }
 0x631   :  { %v1212_v24 = vpop.f32.mrb[8].mxu1  ;;  %v1284_v25 = vpop.f32.mrb[8].mxu0 }
 0x632   :  { %v1290_v26 = vmax.f32 %v1212_v24, %v1284_v25  ;;  %v2898_v27 = vpop.f32.mrb[9].mxu1  ;;  %v2910_v28 = vpop.f32.mrb[9].mxu0 }
 0x633   :  { %v1215_v29 = vpop.f32.mrb[10].mxu1  ;;  %v1287_v30 = vpop.f32.mrb[10].mxu0 }
 0x634   :  { %v1292_v31 = vrot.slane %v1290_v26, 7  ;;  %v2899_v32 = vpop.f32.mrb[11].mxu1  ;;  %v2911_v33 = vpop.f32.mrb[11].mxu0  ;;  %v1380_v41 = vpack.c.bf16 %v1290_v26, %v1290_v26  ;;  %v1302_v42 = vrot.slane %v1290_v26, 1  ;;  %v3153_v26 = vld [vmem:[#allocation34 + $0x28] sm:$0xff]  }
 0x635   :  { %v1676_v28 = vpop.permute.xlu1 %1675  ;;  %v3155_v32 = vld [vmem:[#allocation37] sm:$0xff]   ;;  %v3156_v33 = vld [vmem:[#allocation35 + $0x8] sm:$0xff]  }
 0x636   :  { %v1294_v35 = vsel %vm428_vm0, 0.0, %v1292_v31  ;;  %v1304_v44 = vsel %vm469_vm2, %v1302_v42, 0.0  ;;  %v3154_v31 = vld [vmem:[#allocation35] sm:$0xff]  }
 0x637   :  { %v1301_v36 = vmul.f32 %v1299_v34, %v1294_v35  ;;  %v1311_v46 = vmul.f32 %v1309_v45, %v1304_v44  ;;  %v3157_v34 = vld [vmem:[#allocation37 + $0x8] sm:$0xff]   ;;  %v3158_v35 = vld [vmem:[#allocation35 + $0x10] sm:$0xff]  }
 0x639   :  { %v1313_v38 = vpack.c.bf16 %v1301_v36, %v1301_v36  ;;  %v1441_v47 = vpack.c.bf16 %v1311_v46, %v1311_v46  ;;  %v3159_v36 = vld [vmem:[#allocation37 + $0x10] sm:$0xff]  }
 0x63b   :  { %2917 = vmatmul.mubr.msk.bf16.vlgmr.msra.gmra.mrb[12].mxu1 %vm955_vm5, %v1313_v38  ;;  %v3161_v38 = vld [vmem:[#allocation37 + $0x18] sm:$0xff]  }
 0x63c   :  { %2921 = vmatpush3.bf16.msra.mxu1 %v3136_v37  ;;  %2924 = vmatprep.mubr.msk.bf16.mxu1 %vm3794_vm3, %v3793_v63  ;;  %v3160_v37 = vld [vmem:[#allocation35 + $0x18] sm:$0xff]  }
 0x63d   :  { %2922 = vmatprep.subr.bf16.mxu1 %v3793_v63 }
 0x640   :  { %2923 = vmatpush3.bf16.msra.mxu1 %v3137_v39  ;;  %v3164_v39 = vld [vmem:[%s4370_s13 + $0x4] ss:$16 sps:$4 sm:$0xff]  }
 0x641   :  { %2928 = vmatprep.subr.bf16.mxu1 %v3793_v63 }
 0x647   :  { %2925 = vmatmul.mubr.msk.bf16.vlgmr.msra.gmra.mrb[12].mxu1 %vm955_vm5, %v1380_v41 }
 0x648   :  { %2929 = vmatpush3.bf16.msra.mxu1 %v3138_v40  ;;  %2932 = vmatprep.mubr.msk.bf16.mxu1 %vm3794_vm3, %v3793_v63  ;;  %v2642_v40 = vld [vmem:[%s4371_s21] ss:$0 sm:$0xff] }
 0x649   :  { %2930 = vmatprep.subr.bf16.mxu1 %v3793_v63 }
 0x64c   :  { %2931 = vmatpush3.bf16.msra.mxu1 %v3139_v43 }
 0x64d   :  { %2948 = vmatprep.subr.bf16.mxu1 %v3793_v63 }
 0x653   :  { %2933 = vmatmul.mubr.msk.bf16.vlgmr.msra.gmra.mrb[12].mxu1 %vm955_vm5, %v1441_v47 }
 0x654   :  { %2956 = vmatprep.mubr.msk.bf16.mxu1 %vm3794_vm3, %v3793_v63  ;;  %2949 = vmatpush3.bf16.msra.mxu1 %v3141_v49  ;;  %v3162_v49 = vld [vmem:[%s4370_s13] ss:$16 sps:$4 sm:$0xff]  }
 0x655   :  { %2950 = vmatprep.subr.bf16.mxu1 %v3793_v63 }
 0x658   :  { %2951 = vmatpush3.bf16.msra.mxu1 %v3143_v51  ;;  %v3167_v51 = vld [vmem:[%s4370_s13 + $0x24] ss:$16 sps:$4 sm:$0xff]  }
 0x659   :  { %2952 = vmatprep.subr.bf16.mxu1 %v3793_v63 }
 0x65c   :  { %2953 = vmatpush3.bf16.msra.mxu1 %v3145_v53  ;;  %v3170_v53 = vld [vmem:[%s4370_s13 + $0xc] ss:$16 sps:$4 sm:$0xff]  }
 0x65d   :  { %2954 = vmatprep.subr.bf16.mxu1 %v3793_v63 }
 0x660   :  { %2955 = vmatpush3.bf16.msra.mxu1 %v3147_v55  ;;  %v3175_v55 = vld [vmem:[%s3938_s3] sm:$0xff]  }
 0x661   :  { %2984 = vmatprep.subr.bf16.mxu1 %v3793_v63 }
 0x726   :  { %v1495_v57 = vpop.f32.mrb[12].mxu1 }
 0x727   :  { %v3014_v58 = vadd.f32 %v2622_v56, %v1495_v57  ;;  %v2934_v59 = vpop.f32.mrb[13].mxu1  ;;  %v3176_v56 = vld [vmem:[%s3938_s3 + $0x48] sm:$0xff]  }
 0x728   :  { %v1498_v60 = vpop.f32.mrb[14].mxu1  ;;  %v3177_v57 = vld [vmem:[%s3938_s3 + $0x8] sm:$0xff]   ;;  %v3180_v59 = vld [vmem:[%s3938_s3 + $0x10] sm:$0xff]  }
 0x729   :  { %v1502_v61 = vmax.f32 %v3014_v58, 0.0  ;;  %v2935_v62 = vpop.f32.mrb[15].mxu1  ;;  %v3178_v58 = vld [vmem:[%s3938_s3 + $0x50] sm:$0xff]   ;;  %v3182_v60 = vld [vmem:[%s3938_s3 + $0x58] sm:$0xff]  }
 0x72a   :  { %v3186_v62 = vld [vmem:[%s3938_s3 + $0x60] sm:$0xff]  }
 0x72b   :  { %1503 = vst.msk [vmem:[#allocation4] sm:$0xff] %vm729_vm4, %v1502_v61  ;;  %v3184_v61 = vld [vmem:[%s3938_s3 + $0x18] sm:$0xff]  }
 0x732   :  { %v1504_v1 = vld [vmem:[#allocation4] ss:$2 sm:$0xf]  ;;  %v1506_v2 = vld [vmem:[#allocation4 + $0x1] ss:$2 sm:$0xf] }
 0x733   :  { %v1507_v3 = vmax.f32 %v1504_v1, %v1506_v2  ;;  %v3188_v1 = vld [vmem:[%s3938_s3 + $0x20] sm:$0xff]   ;;  %v3190_v2 = vld [vmem:[%s3938_s3 + $0x68] sm:$0xff]  }
 0x735   :  { %v1508_v4 = vpack.c.bf16 %v1507_v3, %v1507_v3  ;;  %v3192_v3 = vld [vmem:[%s3938_s3 + $0x28] sm:$0xff]  }
 0x737   :  { %2945 = vmatmul.mubr.msk.bf16.vlgmr.msra.gmra.mrb[12].mxu0 %vm729_vm4, %v1508_v4  ;;  %2957 = vmatmul.mubr.msk.bf16.vlgmr.msra.gmra.mrb[16].mxu1 %vm729_vm4, %v1508_v4 }
 0x738   :  { %2964 = vmatprep.mubr.msk.bf16.mxu0 %vm3794_vm3, %v3793_v63  ;;  %2992 = vmatprep.mubr.msk.bf16.mxu1 %vm3794_vm3, %v3793_v63 }
 0x739   :  { %2961 = vmatpush3.bf16.msra.mxu0 %v3148_v5  ;;  %2985 = vmatpush3.bf16.msra.mxu1 %v3154_v31  ;;  %v3201_v31 = vld [vmem:[%s3938_s3 + $0xa8] sm:$0xff]  }
 0x73a   :  { %2962 = vmatprep.subr.bf16.mxu0 %v3793_v63  ;;  %2986 = vmatprep.subr.bf16.mxu1 %v3793_v63 }
 0x73d   :  { %2963 = vmatpush3.bf16.msra.mxu0 %v3149_v6  ;;  %2987 = vmatpush3.bf16.msra.mxu1 %v3156_v33  ;;  %v3203_v33 = vld [vmem:[%s3938_s3 + $0xb0] sm:$0xff]  }
 0x73e   :  { %2968 = vmatprep.subr.bf16.mxu0 %v3793_v63  ;;  %2988 = vmatprep.subr.bf16.mxu1 %v3793_v63 }
 0x741   :  { %2989 = vmatpush3.bf16.msra.mxu1 %v3158_v35  ;;  %v3205_v35 = vld [vmem:[%s3938_s3 + $0xb8] sm:$0xff]  }
 0x742   :  { %2990 = vmatprep.subr.bf16.mxu1 %v3793_v63 }
 0x745   :  { %2991 = vmatpush3.bf16.msra.mxu1 %v3160_v37 }
 0x746   :  { %2099 = vmatprep.subr.bf16.mxu1 %v3164_v39  ;;  %v2034_v39 = vld [vmem:[%s3933_s24] sm:$0xf] }
 0x80a   :  { %v1578_v7 = vpop.f32.mrb[12].mxu0  ;;  %v1650_v8 = vpop.f32.mrb[16].mxu1 }
 0x80b   :  { %v1656_v9 = vmax.f32 %v1578_v7, %v1650_v8  ;;  %v2946_v10 = vpop.f32.mrb[13].mxu0  ;;  %v2958_v11 = vpop.f32.mrb[17].mxu1 }
 0x80c   :  { %v1581_v12 = vpop.f32.mrb[14].mxu0  ;;  %v1653_v13 = vpop.f32.mrb[18].mxu1  ;;  %v3168_v11 = vld [vmem:[%s4370_s13 + $0x8] ss:$16 sps:$4 sm:$0xff]  }
 0x80d   :  { %v1658_v14 = vrot.slane %v1656_v9, 7  ;;  %v2947_v15 = vpop.f32.mrb[15].mxu0  ;;  %v2959_v16 = vpop.f32.mrb[19].mxu1  ;;  %v1747_v24 = vpack.c.bf16 %v1656_v9, %v1656_v9  ;;  %v1668_v25 = vrot.slane %v1656_v9, 1 }
 0x80e   :  { %v3173_v15 = vld [vmem:[%s4370_s13 + $0x2c] ss:$16 sps:$4 sm:$0xff]   ;;  %v3171_v16 = vld [vmem:[%s4370_s13 + $0x28] ss:$16 sps:$4 sm:$0xff]  }
 0x80f   :  { %v1660_v18 = vsel %vm428_vm0, 0.0, %v1658_v14  ;;  %v1671_v27 = vsel %vm1670_vm6, %v1668_v25, 0.0  ;;  %v3195_v25 = vld [vmem:[%s3938_s3 + $0xe0] sm:$0xff]  }
 0x810   :  { %v1667_v19 = vmul.f32 %v1665_v17, %v1660_v18  ;;  %v1678_v29 = vmul.f32 %v1676_v28, %v1671_v27  ;;  %v3179_v17 = vld [vmem:[%s3938_s3 + $0xc0] sm:$0xff]   ;;  %v3198_v28 = vld [vmem:[%s3938_s3 + $0x78] sm:$0xff]  }
 0x811   :  { %v3181_v18 = vld [vmem:[%s3938_s3 + $0x80] sm:$0xff]  }
 0x812   :  { %v1680_v21 = vpack.c.bf16 %v1667_v19, %v1667_v19  ;;  %v1808_v30 = vpack.c.bf16 %v1678_v29, %v1678_v29  ;;  %v3183_v19 = vld [vmem:[%s3938_s3 + $0xc8] sm:$0xff]   ;;  %v3197_v27 = vld [vmem:[%s3938_s3 + $0xa0] sm:$0xff]  }
 0x813   :  { %v3199_v29 = vld [vmem:[%s3938_s3 + $0xe8] sm:$0xff]  }
 0x814   :  { %2965 = vmatmul.mubr.msk.bf16.vlgmr.msra.gmra.mrb[16].mxu0 %vm955_vm5, %v1680_v21  ;;  %v3187_v21 = vld [vmem:[%s3938_s3 + $0xd0] sm:$0xff]  }
 0x815   :  { %2969 = vmatpush3.bf16.msra.mxu0 %v3150_v20  ;;  %2972 = vmatprep.mubr.msk.bf16.mxu0 %vm3794_vm3, %v3793_v63  ;;  %v3185_v20 = vld [vmem:[%s3938_s3 + $0x88] sm:$0xff]  }
 0x816   :  { %2970 = vmatprep.subr.bf16.mxu0 %v3793_v63 }
 0x819   :  { %2971 = vmatpush3.bf16.msra.mxu0 %v3151_v22  ;;  %v3191_v22 = vld [vmem:[%s3938_s3 + $0xd8] sm:$0xff]  }
 0x81a   :  { %2976 = vmatprep.subr.bf16.mxu0 %v3793_v63 }
 0x820   :  { %2973 = vmatmul.mubr.msk.bf16.vlgmr.msra.gmra.mrb[16].mxu0 %vm955_vm5, %v1747_v24  ;;  %v3194_v24 = vld [vmem:[%s3938_s3 + $0x70] sm:$0xff]  }
 0x821   :  { %2977 = vmatpush3.bf16.msra.mxu0 %v3152_v23  ;;  %2980 = vmatprep.mubr.msk.bf16.mxu0 %vm3794_vm3, %v3793_v63  ;;  %v3193_v23 = vld [vmem:[%s3938_s3 + $0x98] sm:$0xff]  }
 0x822   :  { %2978 = vmatprep.subr.bf16.mxu0 %v3793_v63 }
 0x825   :  { %2979 = vmatpush3.bf16.msra.mxu0 %v3153_v26  ;;  %v3196_v26 = vld [vmem:[%s3938_s3 + $0x30] sm:$0xff]  }
 0x826   :  { %2996 = vmatprep.subr.bf16.mxu0 %v3793_v63 }
 0x82c   :  { %2981 = vmatmul.mubr.msk.bf16.vlgmr.msra.gmra.mrb[16].mxu0 %vm955_vm5, %v1808_v30  ;;  %v3200_v30 = vld [vmem:[%s3938_s3 + $0x38] sm:$0xff]  }
 0x82d   :  { %3004 = vmatprep.mubr.msk.bf16.mxu0 %vm3794_vm3, %v3793_v63  ;;  %2997 = vmatpush3.bf16.msra.mxu0 %v3155_v32  ;;  %v3202_v32 = vld [vmem:[%s3938_s3 + $0xf0] sm:$0xff]  }
 0x82e   :  { %2998 = vmatprep.subr.bf16.mxu0 %v3793_v63 }
 0x831   :  { %2999 = vmatpush3.bf16.msra.mxu0 %v3157_v34  ;;  %v3204_v34 = vld [vmem:[%s3938_s3 + $0xf8] sm:$0xff]  }
 0x832   :  { %3000 = vmatprep.subr.bf16.mxu0 %v3793_v63 }
 0x835   :  { %3001 = vmatpush3.bf16.msra.mxu0 %v3159_v36  ;;  %v2036_v36 = vlaneseq }
 0x836   :  { %3002 = vmatprep.subr.bf16.mxu0 %v3793_v63 }
 0x837   :  { %v2037_v37 = vshrl.u32 %v2036_v36, 7 }
 0x839   :  { %3003 = vmatpush3.bf16.msra.mxu0 %v3161_v38  ;;  %v2038_v38 = vsub.s32 0, %v2037_v37 }
 0x83a   :  { %2778 = vmatprep.subr.bf16.mxu0 %v3174_v54 }
 0x8ff   :  { %v1862_v41 = vpop.f32.mrb[16].mxu0 }
 0x900   :  { %v3015_v42 = vadd.f32 %v2642_v40, %v1862_v41  ;;  %v2982_v43 = vpop.f32.mrb[17].mxu0  ;;  %v2042_v40 = vsub.s32 1, %v2037_v37  ;;  %v2039_v41 = vrot.slane %v2034_v39, %v2038_v38 }
 0x901   :  { %v1865_v44 = vpop.f32.mrb[18].mxu0 }
 0x902   :  { %v1869_v45 = vmax.f32 %v3015_v42, 0.0  ;;  %v2983_v46 = vpop.f32.mrb[19].mxu0  ;;  %v2043_v42 = vrot.slane %v2034_v39, %v2042_v40 }
 0x903   :  { %v2046_v46 = vsub.s32 2, %v2037_v37 }
 0x904   :  { %1871 = vst.msk [vmem:[#allocation5] sm:$0xf] %vm1870_vm7, %v1869_v45 }
 0x90b   :  { %v1872_v47 = vld [vmem:[#allocation5] ss:$2 sm:$0x3]  ;;  %v1874_v63 = vld [vmem:[#allocation5 + $0x1] ss:$2 sm:$0x3] }
 0x90c   :  { %v1875_v48 = vmax.f32 %v1872_v47, %v1874_v63 }
 0x90e   :  { %v1876_v50 = vpack.c.bf16 %v1875_v48, %v1875_v48  ;;  %v2050_v48 = vsub.s32 3, %v2037_v37 }
 0x910   :  { %2993 = vmatmul.mubr.msk.bf16.vlgmr.msra.gmra.mrb[20].mxu1 %vm729_vm4, %v1876_v50  ;;  %3005 = vmatmul.mubr.msk.bf16.vlgmr.msra.gmra.mrb[20].mxu0 %vm729_vm4, %v1876_v50  ;;  %v2051_v54 = vrot.slane %v2034_v39, %v2050_v48 }
 0x911   :  { %2100 = vmatpush1.bf16.msra.mxu1 %v3162_v49  ;;  %2131 = vmatprep.mubr.bf16.mxu1 %v3792_v0 }
 0x912   :  { %2101 = vmatprep.subr.bf16.mxu1 %v3167_v51  ;;  %2779 = vmatpush3.bf16.msra.mxu0 %v3175_v55 }
 0x913   :  { %2780 = vmatprep.subr.bf16.mxu0 %v3176_v56 }
 0x915   :  { %2102 = vmatpush1.bf16.msra.mxu1 %v3165_v52  ;;  %v2047_v52 = vrot.slane %v2034_v39, %v2046_v46 }
 0x916   :  { %2140 = vmatprep.subr.bf16.mxu1 %v3170_v53  ;;  %2781 = vmatpush3.bf16.msra.mxu0 %v3177_v57 }
 0x917   :  { %2782 = vmatprep.subr.bf16.mxu0 %v3178_v58 }
 0x91a   :  { %2783 = vmatpush3.bf16.msra.mxu0 %v3180_v59 }
 0x91b   :  { %2784 = vmatprep.subr.bf16.mxu0 %v3182_v60 }
 0x91e   :  { %2785 = vmatpush3.bf16.msra.mxu0 %v3184_v61 }
 0x91f   :  { %2786 = vmatprep.subr.bf16.mxu0 %v3186_v62 }
 0x922   :  { %2787 = vmatpush3.bf16.msra.mxu0 %v3188_v1 }
 0x923   :  { %2788 = vmatprep.subr.bf16.mxu0 %v3190_v2 }
 0x926   :  { %2789 = vmatpush3.bf16.msra.mxu0 %v3192_v3 }
 0x927   :  { %2790 = vmatprep.subr.bf16.mxu0 %v3194_v24 }
 0x92a   :  { %2791 = vmatpush3.bf16.msra.mxu0 %v3196_v26 }
 0x92b   :  { %2792 = vmatprep.subr.bf16.mxu0 %v3198_v28 }
 0x92e   :  { %2793 = vmatpush3.bf16.msra.mxu0 %v3200_v30 }
 0x9e3   :  { %v1946_v4 = vpop.f32.mrb[20].mxu1  ;;  %v2018_v5 = vpop.f32.mrb[20].mxu0 }
 0x9e4   :  { %v2024_v6 = vmax.f32 %v1946_v4, %v2018_v5  ;;  %v2994_v7 = vpop.f32.mrb[21].mxu1  ;;  %v3006_v8 = vpop.f32.mrb[21].mxu0 }
 0x9e5   :  { %v1949_v9 = vpop.f32.mrb[22].mxu1  ;;  %v2021_v10 = vpop.f32.mrb[22].mxu0 }
 0x9e6   :  { %v2025_v12 = vpack.c.bf16 %v2024_v6, %v2024_v6  ;;  %v2995_v13 = vpop.f32.mrb[23].mxu1  ;;  %v3007_v14 = vpop.f32.mrb[23].mxu0  ;;  %v2669_v9 = vld [vmem:[%s3943_s6] ss:$0 sm:$0xff] }
 0x9e8   :  { %2667 = vmatmul.mubr.msk.bf16.vlgmr.msra.gmra.mrb[24].mxu1 %vm955_vm5, %v2025_v12 }
 0x9e9   :  { %2141 = vmatpush1.bf16.msra.mxu1 %v3168_v11  ;;  %2172 = vmatprep.mubr.bf16.mxu1 %v3792_v0  ;;  %v3189_v0 = vld [vmem:[%s3938_s3 + $0x90] sm:$0xff]  }
 0x9ea   :  { %2142 = vmatprep.subr.bf16.mxu1 %v3173_v15 }
 0x9ed   :  { %2143 = vmatpush1.bf16.msra.mxu1 %v3171_v16 }
 0x9ee   :  { %2800 = vmatprep.subr.bf16.mxu1 %v3179_v17 }
 0x9f0   :  { %2668 = vmatmul.mubr.msk.bf16.vlgmr.msra.gmra.mrb[28].mxu1 %vm955_vm5, %v2025_v12 }
 0x9f1   :  { %2801 = vmatpush3.bf16.msra.mxu1 %v3181_v18 }
 0x9f2   :  { %2802 = vmatprep.subr.bf16.mxu1 %v3183_v19 }
 0x9f5   :  { %2803 = vmatpush3.bf16.msra.mxu1 %v3185_v20 }
 0x9f6   :  { %2804 = vmatprep.subr.bf16.mxu1 %v3187_v21 }
 0x9f9   :  { %2805 = vmatpush3.bf16.msra.mxu1 %v3189_v0 }
 0x9fa   :  { %2806 = vmatprep.subr.bf16.mxu1 %v3191_v22 }
 0x9fd   :  { %2807 = vmatpush3.bf16.msra.mxu1 %v3193_v23 }
 0x9fe   :  { %2808 = vmatprep.subr.bf16.mxu1 %v3195_v25 }
 0xa01   :  { %2809 = vmatpush3.bf16.msra.mxu1 %v3197_v27 }
 0xa02   :  { %2810 = vmatprep.subr.bf16.mxu1 %v3199_v29 }
 0xa05   :  { %2811 = vmatpush3.bf16.msra.mxu1 %v3201_v31 }
 0xa06   :  { %2812 = vmatprep.subr.bf16.mxu1 %v3202_v32 }
 0xa09   :  { %2813 = vmatpush3.bf16.msra.mxu1 %v3203_v33 }
 0xa0a   :  { %2814 = vmatprep.subr.bf16.mxu1 %v3204_v34 }
 0xa0d   :  { %2815 = vmatpush3.bf16.msra.mxu1 %v3205_v35 }
 0xabb   :  { %v2133_v43 = vpop.f32.mrb[24].mxu1 }
 0xabc   :  { %v2134_v44 = vadd.f32 %v2133_v43, %v2039_v41  ;;  %v2135_v45 = vpop.f32.mrb[25].mxu1 }
 0xabd   :  { %v2136_v47 = vadd.f32 %v2135_v45, %v2043_v42  ;;  %v2137_v63 = vpop.f32.mrb[26].mxu1 }
 0xabe   :  { %v2181_v49 = vmax.f32 %v2134_v44, 0.0  ;;  %v2138_v50 = vpop.f32.mrb[27].mxu1 }
 0xabf   :  { %v2182_v51 = vmax.f32 %v2136_v47, 0.0 }
 0xac0   :  { %v2185_v55 = vpack.c.bf16 %v2181_v49, %v2181_v49 }
 0xac1   :  { %v2186_v53 = vpack.c.bf16 %v2182_v51, %v2182_v51 }
 0xac3   :  { %v2174_v56 = vpop.f32.mrb[28].mxu1  ;;  %2484 = vmatprep.mubr.bf16.mxu0 %v2186_v53 }
 0xac4   :  { %v2175_v57 = vadd.f32 %v2174_v56, %v2047_v52  ;;  %v2176_v58 = vpop.f32.mrb[29].mxu1  ;;  %2485 = vmatmul.mubr.bf16.vlgmr.msra.gmra.mrb[24].mxu0 %v2185_v55 }
 0xac5   :  { %v2177_v59 = vadd.f32 %v2176_v58, %v2051_v54  ;;  %v2178_v60 = vpop.f32.mrb[30].mxu1 }
 0xac6   :  { %v2183_v61 = vmax.f32 %v2175_v57, 0.0  ;;  %v2179_v62 = vpop.f32.mrb[31].mxu1 }
 0xac7   :  { %v2184_v1 = vmax.f32 %v2177_v59, 0.0 }
 0xac8   :  { %v2187_v3 = vpack.c.bf16 %v2183_v61, %v2183_v61 }
 0xac9   :  { %v2188_v2 = vpack.c.bf16 %v2184_v1, %v2184_v1 }
 0xacb   :  { %2524 = vmatprep.mubr.bf16.mxu1 %v2188_v2 }
 0xacc   :  { %2525 = vmatmul.mubr.bf16.vlgmr.msra.gmra.mrb[32].mxu1 %v2187_v3 }
 0xb97   :  { %v2794_v4 = vpop.f32.mrb[24].mxu0 }
 0xb98   :  { %v2795_v5 = vpop.f32.mrb[25].mxu0 }
 0xb99   :  { %v2796_v6 = vadd.f32 %v2795_v5, %v2794_v4  ;;  %v2797_v7 = vpop.f32.mrb[26].mxu0 }
 0xb9a   :  { %v2798_v8 = vpop.f32.mrb[27].mxu0 }
 0xb9b   :  { %v2487_v12 = vadd.f32 %v2796_v6, %v2669_v9 }
 0xb9f   :  { %v2816_v10 = vpop.f32.mrb[32].mxu1 }
 0xba0   :  { %v2817_v11 = vpop.f32.mrb[33].mxu1 }
 0xba1   :  { %v2818_v13 = vadd.f32 %v2817_v11, %v2816_v10  ;;  %v2819_v14 = vpop.f32.mrb[34].mxu1 }
 0xba2   :  { %v2820_v15 = vpop.f32.mrb[35].mxu1 }
 0xba3   :  { %v2527_v16 = vadd.f32 %v2818_v13, %v2487_v12 }
 0xba5   :  { %v2532_v17 = vmax.f32 %v2527_v16, 0.0 }
 0xba7   :  { %2533 = vst [vmem:[%s3948_s14] sm:$0x3] %v2532_v17 }
 0xba8   :  { %2538 = vsyncpa [#allocation7], 1 }
 0xba9   :  { %2539 = vsyncpa [#allocation9], 1 }
 0xbaa   :  { %2540 = vsyncpa [#allocation12], 1 }
 0xbab   :  { %2541 = vsyncpa [#allocation15], 1 }
 0xbac   :  { %2542 = vsyncpa [#allocation18], 1 }
 0xbad   :  { %2543 = vsyncpa [#allocation21], 1 }
 0xbae   :  { %2544 = vsyncpa [#allocation24], 1 }
 0xbaf   :  { %2545 = vsyncpa [#allocation27], 1 }
 0xbb0   :  { %2546 = vsyncpa [#allocation30], 1 }
 0xbb1   :  { %2547 = vsyncpa [#allocation33], 1 }
 0xbb2   :  { %2548 = vsyncpa [#allocation36], 1 }
 0xbb3   :  { %2549 = vsyncpa [#allocation39], 1 }

</bundles_post_ra>
